<compile_context>
chip_gen: v7x
topology: tpu7x:2x2x1
jax: 0.10.0
libtpu: 0.0.40
codegen_flags: <defaults>
</compile_context>

<pallas_src>
import numpy as np
import jax
import jax.numpy as jnp
from jax.experimental import pallas as pl
from jax.experimental.pallas import tpu as pltpu

LRELU_SLOPE = 0.2  # TODO(synk): verify ActivationLayer('lrelu') slope (assumed 0.2, not 0.01).


def _lrelu(x):
    return jnp.where(x >= 0, x, LRELU_SLOPE * x)


# ---------------------------------------------------------------------------
# Kernel 1: fused conv_in (3x3, pad 1, stride 1) + LeakyReLU, with the two 1x1
# convolutions that consume its output fused into the epilogue:
#   y1    = lrelu(conv3x3(x) + b3)
#   main  = lrelu(y1 @ w_out   + b_out)     (UpBlock.conv_out, 1x1)
#   style = lrelu(y1 @ w_style + b_style)   (StyleBlock.conv,  1x1 -> 512)
# One grid program per batch element ("parallel"); all spatial positions are
# folded into the matmul M dimension (M = H*W), 9 tap matmuls per program.
# Bias / weight-tap loads are hoisted (bound once per grid step).
# ---------------------------------------------------------------------------
def conv_in_fused_kernel(x_ref, w3_ref, b3_ref, wo_ref, bo_ref, ws_ref, bs_ref,
                         main_ref, style_ref):
    _, H, W, Cm = main_ref.shape
    Cs = style_ref.shape[3]
    Cin = x_ref.shape[3]

    acc = jnp.zeros((H * W, Cin), jnp.float32)
    for ky in range(3):
        for kx in range(3):
            patch = x_ref[0, ky:ky + H, kx:kx + W, :].reshape(H * W, Cin)
            acc += jnp.dot(patch, w3_ref[ky, kx],
                           preferred_element_type=jnp.float32)
    y1 = _lrelu(acc + b3_ref[...])                                    # (H*W, Cin)

    main = _lrelu(jnp.dot(y1, wo_ref[...],
                          preferred_element_type=jnp.float32) + bo_ref[...])
    style = _lrelu(jnp.dot(y1, ws_ref[...],
                           preferred_element_type=jnp.float32) + bs_ref[...])
    main_ref[0] = main.reshape(H, W, Cm)
    style_ref[0] = style.reshape(H, W, Cs)


def conv_in_fused(x_nhwc, p):
    N, H, W, Cin = x_nhwc.shape
    Cm = p['conv_out_w'].shape[1]
    Cs = p['style_conv_w'].shape[1]
    xp = jnp.pad(x_nhwc, ((0, 0), (1, 1), (1, 1), (0, 0)))
    Hp, Wp = H + 2, W + 2
    return pl.pallas_call(
        conv_in_fused_kernel,
        out_shape=(jax.ShapeDtypeStruct((N, H, W, Cm), jnp.float32),
                   jax.ShapeDtypeStruct((N, H, W, Cs), jnp.float32)),
        grid=(N,),
        in_specs=[
            pl.BlockSpec((1, Hp, Wp, Cin), lambda n: (n, 0, 0, 0)),
            pl.BlockSpec((3, 3, Cin, Cin), lambda n: (0, 0, 0, 0)),
            pl.BlockSpec((1, Cin), lambda n: (0, 0)),
            pl.BlockSpec((Cin, Cm), lambda n: (0, 0)),
            pl.BlockSpec((1, Cm), lambda n: (0, 0)),
            pl.BlockSpec((Cin, Cs), lambda n: (0, 0)),
            pl.BlockSpec((1, Cs), lambda n: (0, 0)),
        ],
        out_specs=(pl.BlockSpec((1, H, W, Cm), lambda n: (n, 0, 0, 0)),
                   pl.BlockSpec((1, H, W, Cs), lambda n: (n, 0, 0, 0))),
        compiler_params=pltpu.CompilerParams(dimension_semantics=("parallel",)),
    )(xp, p['conv_in_w'], p['conv_in_b'].reshape(1, Cin),
      p['conv_out_w'], p['conv_out_b'].reshape(1, Cm),
      p['style_conv_w'], p['style_conv_b'].reshape(1, Cs))


# ---------------------------------------------------------------------------
# Kernel 2: StyleBlock 3x3 conv, padding=1, stride=2, bias, LeakyReLU.
# The 9 stride-2 taps are gathered in the wrapper (cheap XLA strided slices), so
# the kernel only computes the Ho*Wo outputs needed.  Batch is folded into the
# matmul M dimension (one weight pass total); the output-channel axis is tiled
# over a "parallel" grid so the bf16 weight DMA pipelines with compute (and can
# be split across v7x's two TensorCores).  f32 accumulation.
# ---------------------------------------------------------------------------
def style_conv_kernel(x_ref, w_ref, b_ref, o_ref):
    M, TN = o_ref.shape
    acc = jnp.zeros((M, TN), jnp.float32)
    for t in range(9):
        acc += jnp.dot(x_ref[t], w_ref[t], preferred_element_type=jnp.float32)
    o_ref[...] = _lrelu(acc + b_ref[...])


def style_conv_s2(x_nhwc, w_hwio_bf16, b, *, tn=128):
    N, H, W, C = x_nhwc.shape
    Cout = w_hwio_bf16.shape[-1]
    Ho = (H - 1) // 2 + 1
    Wo = (W - 1) // 2 + 1
    xp = jnp.pad(x_nhwc, ((0, 0), (1, 1), (1, 1), (0, 0)))
    taps = [xp[:, ky:ky + 2 * Ho - 1:2, kx:kx + 2 * Wo - 1:2, :]     # (N, Ho, Wo, C)
            for ky in range(3) for kx in range(3)]
    M = N * Ho * Wo
    xt = jnp.stack(taps, axis=0).reshape(9, M, C).astype(jnp.bfloat16)
    wt = w_hwio_bf16.reshape(9, C, Cout)
    tn = min(tn, Cout)
    out = pl.pallas_call(
        style_conv_kernel,
        out_shape=jax.ShapeDtypeStruct((M, Cout), jnp.float32),
        grid=(Cout // tn,),
        in_specs=[
            pl.BlockSpec((9, M, C), lambda j: (0, 0, 0)),
            pl.BlockSpec((9, C, tn), lambda j: (0, 0, j)),
            pl.BlockSpec((1, tn), lambda j: (0, j)),
        ],
        out_specs=pl.BlockSpec((M, tn), lambda j: (0, j)),
        compiler_params=pltpu.CompilerParams(dimension_semantics=("parallel",)),
    )(xt, wt, b.reshape(1, Cout))
    return out.reshape(N, Ho, Wo, Cout)


# ---------------------------------------------------------------------------
# Kernel 3: StyleBlock head: dropout(p=0.5, always on) -> fc_layer (wp_enc) and
# fc_layer2 -> sigmoid (blender), fused.  Both bf16 weight streams are tiled
# over the output axis ("parallel" grid) so the ~8 MiB of FC weights are
# pipelined with compute instead of exposed as a single blocking DMA.
# ---------------------------------------------------------------------------
def style_head_kernel(x_ref, m_ref, w1_ref, b1_ref, w2_ref, b2_ref,
                      wp_ref, bl_ref):
    xd = (x_ref[...] * m_ref[...]).astype(jnp.bfloat16)   # inverted dropout (mask * 2)
    wp = jnp.dot(xd, w1_ref[...], preferred_element_type=jnp.float32) + b1_ref[...]
    z = jnp.dot(xd, w2_ref[...], preferred_element_type=jnp.float32) + b2_ref[...]
    wp_ref[...] = wp
    bl_ref[...] = 1.0 / (1.0 + jnp.exp(-z))


def style_head(x_flat, drop_mask, w1, b1, w2, b2, *, tn=256):
    B, K = x_flat.shape
    Nout = w1.shape[1]
    tn = min(tn, Nout)
    return pl.pallas_call(
        style_head_kernel,
        out_shape=(jax.ShapeDtypeStruct((B, Nout), jnp.float32),
                   jax.ShapeDtypeStruct((B, Nout), jnp.float32)),
        grid=(Nout // tn,),
        in_specs=[
            pl.BlockSpec((B, K), lambda j: (0, 0)),
            pl.BlockSpec((B, K), lambda j: (0, 0)),
            pl.BlockSpec((K, tn), lambda j: (0, j)),
            pl.BlockSpec((1, tn), lambda j: (0, j)),
            pl.BlockSpec((K, tn), lambda j: (0, j)),
            pl.BlockSpec((1, tn), lambda j: (0, j)),
        ],
        out_specs=(pl.BlockSpec((B, tn), lambda j: (0, j)),
                   pl.BlockSpec((B, tn), lambda j: (0, j))),
        compiler_params=pltpu.CompilerParams(dimension_semantics=("parallel",)),
    )(x_flat, drop_mask, w1, b1.reshape(1, Nout), w2, b2.reshape(1, Nout))


# ---------------------------------------------------------------------------
# Kernel 4: bilinear x2 upsample, align_corners=True, in NHWC.
# H-interp: (2H, H) @ (H, W*C) matmul (W*C lanes).  W-interp: a second matmul
# against kron(A_w^T, I_C), i.e. (W*C, 2W*C) -> lane-dense 2W*C-wide stores.
# grid=(N,) "parallel"; no per-(n, c) micro-programs, no input transpose.
# ---------------------------------------------------------------------------
def bilinear_matrix(in_size, out_size):
    A = np.zeros((out_size, in_size), dtype=np.float32)
    if in_size == 1 or out_size == 1:
        A[:, 0] = 1.0
        return A
    scale = (in_size - 1) / (out_size - 1)                # align_corners=True
    for o in range(out_size):
        src = o * scale
        i0 = min(int(np.floor(src)), in_size - 1)
        i1 = min(i0 + 1, in_size - 1)
        frac = src - i0
        A[o, i0] += 1.0 - frac
        A[o, i1] += frac
    return A


def upsample_kernel(x_ref, ah_ref, bw_ref, o_ref):
    t = jnp.dot(ah_ref[...], x_ref[0], preferred_element_type=jnp.float32)   # (2H, W*C)
    o_ref[0] = jnp.dot(t, bw_ref[...], preferred_element_type=jnp.float32)   # (2H, 2W*C)


def bilinear_upsample_x2_nhwc(x_nhwc):
    N, H, W, C = x_nhwc.shape
    Ho, Wo = 2 * H, 2 * W
    ah = jnp.asarray(bilinear_matrix(H, Ho))                            # (2H, H)
    aw = bilinear_matrix(W, Wo)                                         # (2W, W)
    bw = jnp.asarray(np.kron(aw.T, np.eye(C, dtype=np.float32)))        # (W*C, 2W*C)
    x2 = x_nhwc.reshape(N, H, W * C)
    out = pl.pallas_call(
        upsample_kernel,
        out_shape=jax.ShapeDtypeStruct((N, Ho, Wo * C), jnp.float32),
        grid=(N,),
        in_specs=[
            pl.BlockSpec((1, H, W * C), lambda n: (n, 0, 0)),
            pl.BlockSpec((Ho, H), lambda n: (0, 0)),
            pl.BlockSpec((W * C, Wo * C), lambda n: (0, 0)),
        ],
        out_specs=pl.BlockSpec((1, Ho, Wo * C), lambda n: (n, 0, 0)),
        compiler_params=pltpu.CompilerParams(dimension_semantics=("parallel",)),
    )(x2, ah, bw)
    return out.reshape(N, Ho, Wo, C)


# ---------------------------------------------------------------------------
# Parameter init (deterministic, synthetic) and UpBlock forward.
# ---------------------------------------------------------------------------
def init_params(key, in_channels, out_channels, res):
    shape = 512
    res_eff = min(res, 4)
    n_style = res_eff - 1
    keys = jax.random.split(key, 16)

    def w(k, shp, scale=0.05, dtype=jnp.float32):
        return (jax.random.normal(k, shp, jnp.float32) * scale).astype(dtype)

    p = {}
    p['conv_in_w'] = w(keys[0], (3, 3, in_channels, in_channels))          # HWIO, f32
    p['conv_in_b'] = w(keys[1], (in_channels,))
    if in_channels != shape:
        p['style_conv_w'] = w(keys[2], (in_channels, shape))               # 1x1 as (I, O)
        p['style_conv_b'] = w(keys[3], (shape,))
    kk = jax.random.split(keys[4], max(2 * n_style, 2))
    # heavy 3x3 style weights kept in bf16 (f32 accumulation inside the kernel)
    p['style_blocks'] = [(w(kk[2 * i], (3, 3, shape, shape), 0.02, jnp.bfloat16),
                          w(kk[2 * i + 1], (shape,)))
                         for i in range(n_style)]
    p['fc1_w'] = w(keys[5], (shape * 4, shape * 2), 0.02, jnp.bfloat16)
    p['fc1_b'] = w(keys[6], (shape * 2,))
    p['fc2_w'] = w(keys[7], (shape * 4, shape * 2), 0.02, jnp.bfloat16)
    p['fc2_b'] = w(keys[8], (shape * 2,))
    if in_channels != out_channels:
        p['conv_out_w'] = w(keys[9], (in_channels, out_channels))          # 1x1 as (I, O)
        p['conv_out_b'] = w(keys[10], (out_channels,))
    return p


def up_block_forward(params, x_nchw, *, upsample=True, dropout_seed=0):
    # External interface NCHW (PyTorch); NHWC inside the kernels.
    # TODO(synk): configs without conv_out / the StyleBlock 1x1 (in==out or in==512) and
    # the res > 4 AdaptiveAvgPool2d branch are not exercised by this fused path.
    x = jnp.transpose(x_nchw, (0, 2, 3, 1)).astype(jnp.float32)            # NHWC

    # conv_in (3x3) with conv_out (1x1) and StyleBlock's 1x1 fused into its epilogue.
    y_main, s = conv_in_fused(x, params)

    # StyleBlock stride-2 3x3 convs (res=3: 8x8 -> 4x4 -> 2x2).
    for (wb, bb) in params['style_blocks']:
        s = style_conv_s2(s, wb, bb)

    # Flatten in NCHW (c, h, w) order to match torch's x.view(b, -1) on a contiguous tensor.
    Ns, Hs, Ws, Cs = s.shape
    s_flat = jnp.transpose(s, (0, 3, 1, 2)).reshape(Ns, Cs * Hs * Ws)

    # F.dropout(p=0.5, training=True): Bernoulli keep-mask built with jax.random (the
    # TPU hardware PRNG primitives do not lower in interpret mode); 1/(1-p)=2 scale
    # folded into the mask.  TODO(synk): cannot reproduce the torch RNG stream bit-for-bit.
    keep = jax.random.bernoulli(jax.random.PRNGKey(dropout_seed), 0.5, s_flat.shape)
    drop_mask = keep.astype(jnp.float32) * 2.0

    wp_enc, blender = style_head(s_flat, drop_mask,
                                 params['fc1_w'], params['fc1_b'],
                                 params['fc2_w'], params['fc2_b'])

    if upsample:
        y_main = bilinear_upsample_x2_nhwc(y_main)                         # align_corners=True
    y = jnp.transpose(y_main, (0, 3, 1, 2))                                # back to NCHW
    return y, wp_enc, blender


if __name__ == "__main__":
    key = jax.random.PRNGKey(0)
    k_in, k_p = jax.random.split(key)

    in_channels, out_channels, res = 8, 16, 3
    B, H, W = 2, 8, 8     # res=3 -> 8x8 spatial so StyleBlock flattens to 512*2*2 = 2048

    x = jax.random.normal(k_in, (B, in_channels, H, W), jnp.float32)
    params = init_params(k_p, in_channels, out_channels, res)

    y, wp_enc, blender = up_block_forward(params, x, upsample=True, dropout_seed=0)
    jax.block_until_ready((y, wp_enc, blender))

    assert y.shape == (B, out_channels, 2 * H, 2 * W)
    assert wp_enc.shape == (B, 1024)
    assert blender.shape == (B, 1024)
    assert bool(jnp.all(jnp.isfinite(y)))
    assert bool(jnp.all(jnp.isfinite(wp_enc))) and bool(jnp.all(jnp.isfinite(blender)))
    print("KERNEL_OK")
</pallas_src>

<mosaic_0001>
module attributes {stable_mosaic.version = 11 : i64} {
  func.func @conv_in_fused_kernel(%arg0: i32, %arg1: memref<1x10x10x8xf32, #tpu.memory_space<vmem>>, %arg2: memref<3x3x8x8xf32, #tpu.memory_space<vmem>>, %arg3: memref<1x8xf32, #tpu.memory_space<vmem>>, %arg4: memref<8x16xf32, #tpu.memory_space<vmem>>, %arg5: memref<1x16xf32, #tpu.memory_space<vmem>>, %arg6: memref<8x512xf32, #tpu.memory_space<vmem>>, %arg7: memref<1x512xf32, #tpu.memory_space<vmem>>, %arg8: memref<1x8x8x16xf32, #tpu.memory_space<vmem>>, %arg9: memref<1x8x8x512xf32, #tpu.memory_space<vmem>>) attributes {dimension_semantics = [#tpu.dimension_semantics<parallel>], iteration_bounds = array<i64: 2>, scalar_prefetch = 0 : i64, scratch_operands = 0 : i64, tpu.core_type = #tpu.core_type<tc>, window_params = [{transform_indices = @transform_0, window_bounds = array<i64: 1, 10, 10, 8>}, {pipeline_mode = #tpu.pipeline_mode<synchronous>, transform_indices = @transform_1, window_bounds = array<i64: 3, 3, 8, 8>}, {pipeline_mode = #tpu.pipeline_mode<synchronous>, transform_indices = @transform_2, window_bounds = array<i64: 1, 8>}, {pipeline_mode = #tpu.pipeline_mode<synchronous>, transform_indices = @transform_3, window_bounds = array<i64: 8, 16>}, {pipeline_mode = #tpu.pipeline_mode<synchronous>, transform_indices = @transform_4, window_bounds = array<i64: 1, 16>}, {pipeline_mode = #tpu.pipeline_mode<synchronous>, transform_indices = @transform_5, window_bounds = array<i64: 8, 512>}, {pipeline_mode = #tpu.pipeline_mode<synchronous>, transform_indices = @transform_6, window_bounds = array<i64: 1, 512>}, {transform_indices = @transform_7, window_bounds = array<i64: 1, 8, 8, 16>}, {transform_indices = @transform_8, window_bounds = array<i64: 1, 8, 8, 512>}]} {
    %cst = arith.constant 0.000000e+00 : f32
    %0 = vector.broadcast %cst : f32 to vector<64x8xf32>
    %c0 = arith.constant 0 : index
    %c0_0 = arith.constant 0 : index
    %c0_1 = arith.constant 0 : index
    %c0_2 = arith.constant 0 : index
    %1 = vector.load %arg1[%c0, %c0_0, %c0_1, %c0_2] : memref<1x10x10x8xf32, #tpu.memory_space<vmem>>, vector<1x8x8x8xf32>
    %2 = vector.shape_cast %1 : vector<1x8x8x8xf32> to vector<8x8x8xf32>
    %3 = vector.shape_cast %2 : vector<8x8x8xf32> to vector<64x8xf32>
    %c0_3 = arith.constant 0 : index
    %c0_4 = arith.constant 0 : index
    %c0_5 = arith.constant 0 : index
    %c0_6 = arith.constant 0 : index
    %4 = vector.load %arg2[%c0_3, %c0_4, %c0_5, %c0_6] : memref<3x3x8x8xf32, #tpu.memory_space<vmem>>, vector<1x1x8x8xf32>
    %5 = vector.shape_cast %4 : vector<1x1x8x8xf32> to vector<8x8xf32>
    %cst_7 = arith.constant dense<0.000000e+00> : vector<64x8xf32>
    %6 = tpu.matmul %3, %5, %cst_7 {dimension_numbers = #tpu.dot_dimension_numbers<[1], [0], [0], [1], [0, 0, 1, 1], [], []>} : vector<64x8xf32>, vector<8x8xf32>, vector<64x8xf32> -> vector<64x8xf32>
    %7 = arith.addf %0, %6 : vector<64x8xf32>
    %c0_8 = arith.constant 0 : index
    %c0_9 = arith.constant 0 : index
    %c1 = arith.constant 1 : index
    %c0_10 = arith.constant 0 : index
    %8 = vector.load %arg1[%c0_8, %c0_9, %c1, %c0_10] : memref<1x10x10x8xf32, #tpu.memory_space<vmem>>, vector<1x8x8x8xf32>
    %9 = vector.shape_cast %8 : vector<1x8x8x8xf32> to vector<8x8x8xf32>
    %10 = vector.shape_cast %9 : vector<8x8x8xf32> to vector<64x8xf32>
    %c0_11 = arith.constant 0 : index
    %c1_12 = arith.constant 1 : index
    %c0_13 = arith.constant 0 : index
    %c0_14 = arith.constant 0 : index
    %11 = vector.load %arg2[%c0_11, %c1_12, %c0_13, %c0_14] : memref<3x3x8x8xf32, #tpu.memory_space<vmem>>, vector<1x1x8x8xf32>
    %12 = vector.shape_cast %11 : vector<1x1x8x8xf32> to vector<8x8xf32>
    %cst_15 = arith.constant dense<0.000000e+00> : vector<64x8xf32>
    %13 = tpu.matmul %10, %12, %cst_15 {dimension_numbers = #tpu.dot_dimension_numbers<[1], [0], [0], [1], [0, 0, 1, 1], [], []>} : vector<64x8xf32>, vector<8x8xf32>, vector<64x8xf32> -> vector<64x8xf32>
    %14 = arith.addf %7, %13 : vector<64x8xf32>
    %c0_16 = arith.constant 0 : index
    %c0_17 = arith.constant 0 : index
    %c2 = arith.constant 2 : index
    %c0_18 = arith.constant 0 : index
    %15 = vector.load %arg1[%c0_16, %c0_17, %c2, %c0_18] : memref<1x10x10x8xf32, #tpu.memory_space<vmem>>, vector<1x8x8x8xf32>
    %16 = vector.shape_cast %15 : vector<1x8x8x8xf32> to vector<8x8x8xf32>
    %17 = vector.shape_cast %16 : vector<8x8x8xf32> to vector<64x8xf32>
    %c0_19 = arith.constant 0 : index
    %c2_20 = arith.constant 2 : index
    %c0_21 = arith.constant 0 : index
    %c0_22 = arith.constant 0 : index
    %18 = vector.load %arg2[%c0_19, %c2_20, %c0_21, %c0_22] : memref<3x3x8x8xf32, #tpu.memory_space<vmem>>, vector<1x1x8x8xf32>
    %19 = vector.shape_cast %18 : vector<1x1x8x8xf32> to vector<8x8xf32>
    %cst_23 = arith.constant dense<0.000000e+00> : vector<64x8xf32>
    %20 = tpu.matmul %17, %19, %cst_23 {dimension_numbers = #tpu.dot_dimension_numbers<[1], [0], [0], [1], [0, 0, 1, 1], [], []>} : vector<64x8xf32>, vector<8x8xf32>, vector<64x8xf32> -> vector<64x8xf32>
    %21 = arith.addf %14, %20 : vector<64x8xf32>
    %c0_24 = arith.constant 0 : index
    %c1_25 = arith.constant 1 : index
    %c0_26 = arith.constant 0 : index
    %c0_27 = arith.constant 0 : index
    %22 = vector.load %arg1[%c0_24, %c1_25, %c0_26, %c0_27] : memref<1x10x10x8xf32, #tpu.memory_space<vmem>>, vector<1x8x8x8xf32>
    %23 = vector.shape_cast %22 : vector<1x8x8x8xf32> to vector<8x8x8xf32>
    %24 = vector.shape_cast %23 : vector<8x8x8xf32> to vector<64x8xf32>
    %c1_28 = arith.constant 1 : index
    %c0_29 = arith.constant 0 : index
    %c0_30 = arith.constant 0 : index
    %c0_31 = arith.constant 0 : index
    %25 = vector.load %arg2[%c1_28, %c0_29, %c0_30, %c0_31] : memref<3x3x8x8xf32, #tpu.memory_space<vmem>>, vector<1x1x8x8xf32>
    %26 = vector.shape_cast %25 : vector<1x1x8x8xf32> to vector<8x8xf32>
    %cst_32 = arith.constant dense<0.000000e+00> : vector<64x8xf32>
    %27 = tpu.matmul %24, %26, %cst_32 {dimension_numbers = #tpu.dot_dimension_numbers<[1], [0], [0], [1], [0, 0, 1, 1], [], []>} : vector<64x8xf32>, vector<8x8xf32>, vector<64x8xf32> -> vector<64x8xf32>
    %28 = arith.addf %21, %27 : vector<64x8xf32>
    %c0_33 = arith.constant 0 : index
    %c1_34 = arith.constant 1 : index
    %c1_35 = arith.constant 1 : index
    %c0_36 = arith.constant 0 : index
    %29 = vector.load %arg1[%c0_33, %c1_34, %c1_35, %c0_36] : memref<1x10x10x8xf32, #tpu.memory_space<vmem>>, vector<1x8x8x8xf32>
    %30 = vector.shape_cast %29 : vector<1x8x8x8xf32> to vector<8x8x8xf32>
    %31 = vector.shape_cast %30 : vector<8x8x8xf32> to vector<64x8xf32>
    %c1_37 = arith.constant 1 : index
    %c1_38 = arith.constant 1 : index
    %c0_39 = arith.constant 0 : index
    %c0_40 = arith.constant 0 : index
    %32 = vector.load %arg2[%c1_37, %c1_38, %c0_39, %c0_40] : memref<3x3x8x8xf32, #tpu.memory_space<vmem>>, vector<1x1x8x8xf32>
    %33 = vector.shape_cast %32 : vector<1x1x8x8xf32> to vector<8x8xf32>
    %cst_41 = arith.constant dense<0.000000e+00> : vector<64x8xf32>
    %34 = tpu.matmul %31, %33, %cst_41 {dimension_numbers = #tpu.dot_dimension_numbers<[1], [0], [0], [1], [0, 0, 1, 1], [], []>} : vector<64x8xf32>, vector<8x8xf32>, vector<64x8xf32> -> vector<64x8xf32>
    %35 = arith.addf %28, %34 : vector<64x8xf32>
    %c0_42 = arith.constant 0 : index
    %c1_43 = arith.constant 1 : index
    %c2_44 = arith.constant 2 : index
    %c0_45 = arith.constant 0 : index
    %36 = vector.load %arg1[%c0_42, %c1_43, %c2_44, %c0_45] : memref<1x10x10x8xf32, #tpu.memory_space<vmem>>, vector<1x8x8x8xf32>
    %37 = vector.shape_cast %36 : vector<1x8x8x8xf32> to vector<8x8x8xf32>
    %38 = vector.shape_cast %37 : vector<8x8x8xf32> to vector<64x8xf32>
    %c1_46 = arith.constant 1 : index
    %c2_47 = arith.constant 2 : index
    %c0_48 = arith.constant 0 : index
    %c0_49 = arith.constant 0 : index
    %39 = vector.load %arg2[%c1_46, %c2_47, %c0_48, %c0_49] : memref<3x3x8x8xf32, #tpu.memory_space<vmem>>, vector<1x1x8x8xf32>
    %40 = vector.shape_cast %39 : vector<1x1x8x8xf32> to vector<8x8xf32>
    %cst_50 = arith.constant dense<0.000000e+00> : vector<64x8xf32>
    %41 = tpu.matmul %38, %40, %cst_50 {dimension_numbers = #tpu.dot_dimension_numbers<[1], [0], [0], [1], [0, 0, 1, 1], [], []>} : vector<64x8xf32>, vector<8x8xf32>, vector<64x8xf32> -> vector<64x8xf32>
    %42 = arith.addf %35, %41 : vector<64x8xf32>
    %c0_51 = arith.constant 0 : index
    %c2_52 = arith.constant 2 : index
    %c0_53 = arith.constant 0 : index
    %c0_54 = arith.constant 0 : index
    %43 = vector.load %arg1[%c0_51, %c2_52, %c0_53, %c0_54] : memref<1x10x10x8xf32, #tpu.memory_space<vmem>>, vector<1x8x8x8xf32>
    %44 = vector.shape_cast %43 : vector<1x8x8x8xf32> to vector<8x8x8xf32>
    %45 = vector.shape_cast %44 : vector<8x8x8xf32> to vector<64x8xf32>
    %c2_55 = arith.constant 2 : index
    %c0_56 = arith.constant 0 : index
    %c0_57 = arith.constant 0 : index
    %c0_58 = arith.constant 0 : index
    %46 = vector.load %arg2[%c2_55, %c0_56, %c0_57, %c0_58] : memref<3x3x8x8xf32, #tpu.memory_space<vmem>>, vector<1x1x8x8xf32>
    %47 = vector.shape_cast %46 : vector<1x1x8x8xf32> to vector<8x8xf32>
    %cst_59 = arith.constant dense<0.000000e+00> : vector<64x8xf32>
    %48 = tpu.matmul %45, %47, %cst_59 {dimension_numbers = #tpu.dot_dimension_numbers<[1], [0], [0], [1], [0, 0, 1, 1], [], []>} : vector<64x8xf32>, vector<8x8xf32>, vector<64x8xf32> -> vector<64x8xf32>
    %49 = arith.addf %42, %48 : vector<64x8xf32>
    %c0_60 = arith.constant 0 : index
    %c2_61 = arith.constant 2 : index
    %c1_62 = arith.constant 1 : index
    %c0_63 = arith.constant 0 : index
    %50 = vector.load %arg1[%c0_60, %c2_61, %c1_62, %c0_63] : memref<1x10x10x8xf32, #tpu.memory_space<vmem>>, vector<1x8x8x8xf32>
    %51 = vector.shape_cast %50 : vector<1x8x8x8xf32> to vector<8x8x8xf32>
    %52 = vector.shape_cast %51 : vector<8x8x8xf32> to vector<64x8xf32>
    %c2_64 = arith.constant 2 : index
    %c1_65 = arith.constant 1 : index
    %c0_66 = arith.constant 0 : index
    %c0_67 = arith.constant 0 : index
    %53 = vector.load %arg2[%c2_64, %c1_65, %c0_66, %c0_67] : memref<3x3x8x8xf32, #tpu.memory_space<vmem>>, vector<1x1x8x8xf32>
    %54 = vector.shape_cast %53 : vector<1x1x8x8xf32> to vector<8x8xf32>
    %cst_68 = arith.constant dense<0.000000e+00> : vector<64x8xf32>
    %55 = tpu.matmul %52, %54, %cst_68 {dimension_numbers = #tpu.dot_dimension_numbers<[1], [0], [0], [1], [0, 0, 1, 1], [], []>} : vector<64x8xf32>, vector<8x8xf32>, vector<64x8xf32> -> vector<64x8xf32>
    %56 = arith.addf %49, %55 : vector<64x8xf32>
    %c0_69 = arith.constant 0 : index
    %c2_70 = arith.constant 2 : index
    %c2_71 = arith.constant 2 : index
    %c0_72 = arith.constant 0 : index
    %57 = vector.load %arg1[%c0_69, %c2_70, %c2_71, %c0_72] : memref<1x10x10x8xf32, #tpu.memory_space<vmem>>, vector<1x8x8x8xf32>
    %58 = vector.shape_cast %57 : vector<1x8x8x8xf32> to vector<8x8x8xf32>
    %59 = vector.shape_cast %58 : vector<8x8x8xf32> to vector<64x8xf32>
    %c2_73 = arith.constant 2 : index
    %c2_74 = arith.constant 2 : index
    %c0_75 = arith.constant 0 : index
    %c0_76 = arith.constant 0 : index
    %60 = vector.load %arg2[%c2_73, %c2_74, %c0_75, %c0_76] : memref<3x3x8x8xf32, #tpu.memory_space<vmem>>, vector<1x1x8x8xf32>
    %61 = vector.shape_cast %60 : vector<1x1x8x8xf32> to vector<8x8xf32>
    %cst_77 = arith.constant dense<0.000000e+00> : vector<64x8xf32>
    %62 = tpu.matmul %59, %61, %cst_77 {dimension_numbers = #tpu.dot_dimension_numbers<[1], [0], [0], [1], [0, 0, 1, 1], [], []>} : vector<64x8xf32>, vector<8x8xf32>, vector<64x8xf32> -> vector<64x8xf32>
    %63 = arith.addf %56, %62 : vector<64x8xf32>
    %c0_78 = arith.constant 0 : index
    %c0_79 = arith.constant 0 : index
    %64 = vector.load %arg3[%c0_78, %c0_79] : memref<1x8xf32, #tpu.memory_space<vmem>>, vector<1x8xf32>
    %65 = vector.broadcast %64 : vector<1x8xf32> to vector<64x8xf32>
    %66 = arith.addf %63, %65 : vector<64x8xf32>
    %cst_80 = arith.constant 0.000000e+00 : f32
    %67 = vector.broadcast %cst_80 : f32 to vector<64x8xf32>
    %68 = arith.cmpf oge, %66, %67 : vector<64x8xf32>
    %cst_81 = arith.constant 2.000000e-01 : f32
    %69 = vector.broadcast %cst_81 : f32 to vector<64x8xf32>
    %70 = arith.mulf %69, %66 : vector<64x8xf32>
    %71 = arith.select %68, %66, %70 : vector<64x8xi1>, vector<64x8xf32>
    %c0_82 = arith.constant 0 : index
    %c0_83 = arith.constant 0 : index
    %72 = vector.load %arg4[%c0_82, %c0_83] : memref<8x16xf32, #tpu.memory_space<vmem>>, vector<8x16xf32>
    %cst_84 = arith.constant dense<0.000000e+00> : vector<64x16xf32>
    %73 = tpu.matmul %71, %72, %cst_84 {dimension_numbers = #tpu.dot_dimension_numbers<[1], [0], [0], [1], [0, 0, 1, 1], [], []>} : vector<64x8xf32>, vector<8x16xf32>, vector<64x16xf32> -> vector<64x16xf32>
    %c0_85 = arith.constant 0 : index
    %c0_86 = arith.constant 0 : index
    %74 = vector.load %arg5[%c0_85, %c0_86] : memref<1x16xf32, #tpu.memory_space<vmem>>, vector<1x16xf32>
    %75 = vector.broadcast %74 : vector<1x16xf32> to vector<64x16xf32>
    %76 = arith.addf %73, %75 : vector<64x16xf32>
    %cst_87 = arith.constant 0.000000e+00 : f32
    %77 = vector.broadcast %cst_87 : f32 to vector<64x16xf32>
    %78 = arith.cmpf oge, %76, %77 : vector<64x16xf32>
    %cst_88 = arith.constant 2.000000e-01 : f32
    %79 = vector.broadcast %cst_88 : f32 to vector<64x16xf32>
    %80 = arith.mulf %79, %76 : vector<64x16xf32>
    %81 = arith.select %78, %76, %80 : vector<64x16xi1>, vector<64x16xf32>
    %c0_89 = arith.constant 0 : index
    %c0_90 = arith.constant 0 : index
    %82 = vector.load %arg6[%c0_89, %c0_90] : memref<8x512xf32, #tpu.memory_space<vmem>>, vector<8x512xf32>
    %cst_91 = arith.constant dense<0.000000e+00> : vector<64x512xf32>
    %83 = tpu.matmul %71, %82, %cst_91 {dimension_numbers = #tpu.dot_dimension_numbers<[1], [0], [0], [1], [0, 0, 1, 1], [], []>} : vector<64x8xf32>, vector<8x512xf32>, vector<64x512xf32> -> vector<64x512xf32>
    %c0_92 = arith.constant 0 : index
    %c0_93 = arith.constant 0 : index
    %84 = vector.load %arg7[%c0_92, %c0_93] : memref<1x512xf32, #tpu.memory_space<vmem>>, vector<1x512xf32>
    %85 = vector.broadcast %84 : vector<1x512xf32> to vector<64x512xf32>
    %86 = arith.addf %83, %85 : vector<64x512xf32>
    %cst_94 = arith.constant 0.000000e+00 : f32
    %87 = vector.broadcast %cst_94 : f32 to vector<64x512xf32>
    %88 = arith.cmpf oge, %86, %87 : vector<64x512xf32>
    %cst_95 = arith.constant 2.000000e-01 : f32
    %89 = vector.broadcast %cst_95 : f32 to vector<64x512xf32>
    %90 = arith.mulf %89, %86 : vector<64x512xf32>
    %91 = arith.select %88, %86, %90 : vector<64x512xi1>, vector<64x512xf32>
    %92 = vector.shape_cast %81 : vector<64x16xf32> to vector<8x8x16xf32>
    %c0_96 = arith.constant 0 : index
    %c0_97 = arith.constant 0 : index
    %c0_98 = arith.constant 0 : index
    %c0_99 = arith.constant 0 : index
    %93 = vector.load %arg8[%c0_96, %c0_97, %c0_98, %c0_99] : memref<1x8x8x16xf32, #tpu.memory_space<vmem>>, vector<1x8x8x16xf32>
    %94 = vector.shape_cast %93 : vector<1x8x8x16xf32> to vector<8x8x16xf32>
    %95 = vector.shape_cast %92 : vector<8x8x16xf32> to vector<1x8x8x16xf32>
    tpu.vector_store %arg8[%c0_96, %c0_97, %c0_98, %c0_99], %95 {strides = array<i32>} : memref<1x8x8x16xf32, #tpu.memory_space<vmem>>, vector<1x8x8x16xf32>,
    %96 = vector.shape_cast %91 : vector<64x512xf32> to vector<8x8x512xf32>
    %c0_100 = arith.constant 0 : index
    %c0_101 = arith.constant 0 : index
    %c0_102 = arith.constant 0 : index
    %c0_103 = arith.constant 0 : index
    %97 = vector.load %arg9[%c0_100, %c0_101, %c0_102, %c0_103] : memref<1x8x8x512xf32, #tpu.memory_space<vmem>>, vector<1x8x8x512xf32>
    %98 = vector.shape_cast %97 : vector<1x8x8x512xf32> to vector<8x8x512xf32>
    %99 = vector.shape_cast %96 : vector<8x8x512xf32> to vector<1x8x8x512xf32>
    tpu.vector_store %arg9[%c0_100, %c0_101, %c0_102, %c0_103], %99 {strides = array<i32>} : memref<1x8x8x512xf32, #tpu.memory_space<vmem>>, vector<1x8x8x512xf32>,
    return
  }
  func.func @transform_0(%arg0: i32) -> (i32, i32, i32, i32) {
    %c0_i32 = arith.constant 0 : i32
    %c0_i32_0 = arith.constant 0 : i32
    %c0_i32_1 = arith.constant 0 : i32
    %c0_i32_2 = arith.constant 0 : i32
    return %arg0, %c0_i32, %c0_i32_0, %c0_i32_1 : i32, i32, i32, i32
  }
  func.func @transform_1(%arg0: i32) -> (i32, i32, i32, i32) {
    %c0_i32 = arith.constant 0 : i32
    %c0_i32_0 = arith.constant 0 : i32
    %c0_i32_1 = arith.constant 0 : i32
    %c0_i32_2 = arith.constant 0 : i32
    %c0_i32_3 = arith.constant 0 : i32
    return %c0_i32, %c0_i32_0, %c0_i32_1, %c0_i32_2 : i32, i32, i32, i32
  }
  func.func @transform_2(%arg0: i32) -> (i32, i32) {
    %c0_i32 = arith.constant 0 : i32
    %c0_i32_0 = arith.constant 0 : i32
    %c0_i32_1 = arith.constant 0 : i32
    return %c0_i32, %c0_i32_0 : i32, i32
  }
  func.func @transform_3(%arg0: i32) -> (i32, i32) {
    %c0_i32 = arith.constant 0 : i32
    %c0_i32_0 = arith.constant 0 : i32
    %c0_i32_1 = arith.constant 0 : i32
    return %c0_i32, %c0_i32_0 : i32, i32
  }
  func.func @transform_4(%arg0: i32) -> (i32, i32) {
    %c0_i32 = arith.constant 0 : i32
    %c0_i32_0 = arith.constant 0 : i32
    %c0_i32_1 = arith.constant 0 : i32
    return %c0_i32, %c0_i32_0 : i32, i32
  }
  func.func @transform_5(%arg0: i32) -> (i32, i32) {
    %c0_i32 = arith.constant 0 : i32
    %c0_i32_0 = arith.constant 0 : i32
    %c0_i32_1 = arith.constant 0 : i32
    return %c0_i32, %c0_i32_0 : i32, i32
  }
  func.func @transform_6(%arg0: i32) -> (i32, i32) {
    %c0_i32 = arith.constant 0 : i32
    %c0_i32_0 = arith.constant 0 : i32
    %c0_i32_1 = arith.constant 0 : i32
    return %c0_i32, %c0_i32_0 : i32, i32
  }
  func.func @transform_7(%arg0: i32) -> (i32, i32, i32, i32) {
    %c0_i32 = arith.constant 0 : i32
    %c0_i32_0 = arith.constant 0 : i32
    %c0_i32_1 = arith.constant 0 : i32
    %c0_i32_2 = arith.constant 0 : i32
    return %arg0, %c0_i32, %c0_i32_0, %c0_i32_1 : i32, i32, i32, i32
  }
  func.func @transform_8(%arg0: i32) -> (i32, i32, i32, i32) {
    %c0_i32 = arith.constant 0 : i32
    %c0_i32_0 = arith.constant 0 : i32
    %c0_i32_1 = arith.constant 0 : i32
    %c0_i32_2 = arith.constant 0 : i32
    return %arg0, %c0_i32, %c0_i32_0, %c0_i32_1 : i32, i32, i32, i32
  }
}

</mosaic_0001>

<bundles_post_ra>
// kernel: tpu_custom_call.1
= control target key start
LH: loop header
LB: loop body
LE: loop exit
PB: predicated region body
PF: predicated region fallthrough
CT: control target
= control target key end

     0   :  { %14 = vsyncpa [#allocation3], 0  ;;  %s3502_s0 = inlined_call_operand.vmem [shape: f32[2,10,10,8], index: 0, kind: input, shape index: {}]   ;;  %s3503_s1 = inlined_call_operand.vmem [shape: f32[3,3,8,8], index: 1, kind: input, shape index: {}]   ;;  %s3504_s2 = inlined_call_operand.vmem [shape: f32[1,8], index: 2, kind: input, shape index: {}]   ;;  %s3505_s3 = inlined_call_operand.vmem [shape: f32[8,16], index: 3, kind: input, shape index: {}]   ;;  %s3506_s4 = inlined_call_operand.vmem [shape: f32[1,16], index: 4, kind: input, shape index: {}]   ;;  %s3507_s5 = inlined_call_operand.vmem [shape: f32[8,512], index: 5, kind: input, shape index: {}]   ;;  %s3508_s6 = inlined_call_operand.vmem [shape: f32[1,512], index: 6, kind: input, shape index: {}]   ;;  %s3509_s7 = inlined_call_operand.hbm [shape: f32[2,8,8,16], index: 7, kind: output, shape index: {0}]   ;;  %s3510_s8 = inlined_call_operand.hbm [shape: f32[2,8,8,512], index: 8, kind: output, shape index: {1}]  }
   0x1   :  { %16 = vsyncpa [#allocation3 + $0x1], 0 }
   0x2   :  { %17 = vsyncpa [#allocation5], 0 }
   0x3   :  { %19 = vsyncpa [#allocation5 + $0x1], 0  ;;  %s3005_s27 = smov 0   ;;  %s3007_s28 = smov 0  }
   0x4   :  { %s3009_s29 = smov 0   ;;  %s3011_s30 = smov 0  }
   0x5 LB: > { %s3026_s9 = sadd.s32 4294967295, %s2951_s30   ;;  %s2342_s10 = sadd.s32 4294967294, %s2951_s30   ;;  %s2951_s30 = sphi %s3011_s30, %s3516_s30   ;;  %s2947_s29 = sphi %s3009_s29, %s3515_s29   ;;  %s2943_s28 = sphi %s3007_s28, %s3514_s28   ;;  %s2939_s27 = sphi %s3005_s27, %s3513_s27  }
   0x6   : > { %s3030_s11 = sadd.s32 1, %s2951_s30   ;;  %s184_s12 = sadd.s32 1, %s2947_s29 }
   0x7   : > { %s181_s13 = ssub.s32 %s2951_s30, %s3030_s11  ;;  %p194_p0 = scmp.ne.s32.totalorder %s2947_s29, %s2943_s28 }
   0x8   : > { %p182_p1 = scmp.eq.s32.totalorder %s181_s13, 0  ;;  %p195_p2 = scmp.eq.s32.totalorder %s3026_s9, 1 }
   0x9   : > { %p200_p3 = scmp.ne.s32.totalorder %s2943_s28, %s2939_s27  ;;  %p201_p4 = scmp.eq.s32.totalorder %s2342_s10, 1 }
   0xa   : > { %s3041_s14 = scalar_select %p182_p1, %s2947_s29, %s184_s12  }
   0xb   : > { %p3043_p5 = por %p195_p2, %p194_p0  ;;  %p3047_p6 = por %p201_p4, %p200_p3 }
   0xc   : > { %p2345_p7 = scmp.ge.s32.totalorder %s2951_s30, 1  ;;  %p271_p8 = scmp.lt.s32.totalorder %s2951_s30, 3 }
   0xe   : > { %p272_p9 = pnand %p2345_p7, %p271_p8 }
   0xf   : > { %v2366_v0 = vld [vmem:[%s3503_s1 + $0x10] sm:$0xff] (!%p272_p9)  ;;  %p310_p10 = scmp.lt.s32.totalorder (!%p272_p9), %s3026_s9, 1  ;;  %v2383_v1 = vld [vmem:[%s3503_s1 + $0x18] sm:$0xff] (!%p272_p9)  ;;  %v2349_v2 = vld [vmem:[%s3503_s1 + $0x8] sm:$0xff] (!%p272_p9)  ;;  %vm334_vm0 = vcmask (!%p272_p9), 64512   ;;  %vm2172_vm10 = vcmask (!%p272_p9), 130048  }
  0x10   : > { %275 = sbr.rel (%p272_p9) target bundleno = 656 (0x290), region = 48  ;;  %2631 = vmatprep.subr.mxu0 (!%p272_p9), %v2366_v0  ;;  %2603 = vmatprep.subr.mxu1 (!%p272_p9), %v2349_v2  ;;  %v323_v3 = vld [vmem:[%s3503_s1] sm:$0xff] (!%p272_p9)  ;;  %v2417_v21 = vld [vmem:[%s3503_s1 + $0x28] sm:$0xff] (!%p272_p9)  ;;  %v2434_v31 = vld [vmem:[%s3503_s1 + $0x30] sm:$0xff] (!%p272_p9)  ;;  %s2511_s20 = sshll.u32 (!%p272_p9), %s3026_s9, 10 }
  0x11   : > { %2632 = vmatpush3.msra.mxu0 (!%p272_p9), %v2366_v0  ;;  %2604 = vmatpush3.msra.mxu1 (!%p272_p9), %v2349_v2  ;;  %v2400_v7 = vld [vmem:[%s3503_s1 + $0x20] sm:$0xff] (!%p272_p9)  ;;  %v2451_v33 = vld [vmem:[%s3503_s1 + $0x38] sm:$0xff] (!%p272_p9)  ;;  %v1825_v40 = vld [vmem:[%s3507_s5 + $0x8] sm:$0xff] (!%p272_p9)  ;;  %s3342_s25 = scalar_lea.hbm (!%p272_p9), %s3509_s7, %s2511_s20 }
  0x12   : > { %2645 = vmatprep.subr.mxu0 (!%p272_p9), %v2383_v1  ;;  %2617 = vmatprep.subr.mxu1 (!%p272_p9), %v323_v3  ;;  %v2468_v35 = vld [vmem:[%s3503_s1 + $0x40] sm:$0xff] (!%p272_p9) }
  0x13   : > { %v1663_v39 = vld [vmem:[%s3505_s3] sm:$0xff] (!%p272_p9) }
  0x14   : > { %v2477_v50 = vld [vmem:[%s3504_s2] ss:$0 sm:$0xff] (!%p272_p9) }
  0x15   : > { %v1824_v2 = vld [vmem:[%s3507_s5] sm:$0xff] (!%p272_p9) }
  0x17   : > { %s311_s23 = scalar_select %p310_p10, %s3026_s9, 1 }
  0x19   : > { %s2807_s26 = smul.u32 160, %s311_s23 }
  0x1b   : > { %s3070_s13 = scalar_lea.vmem %s3502_s0, %s2807_s26  ;;  %s3301_s26 = sand.u32 1, %s2943_s28  }
  0x1c   : > { %v593_v4 = vld [vmem:[%s3070_s13 + $0x2] sm:$0xff]  ;;  %v3074_v5 = vld [vmem:[%s3070_s13 + $0x12] sm:$0xff]  ;;  %s2346_s17 = sshll.u32 %s3301_s26, 6  ;;  %s2347_s22 = sshll.u32 %s3301_s26, 8 }
  0x1d   : > { %v3077_v6 = vld [vmem:[%s3070_s13 + $0x22] sm:$0xff]  ;;  %2633 = vmatprep.mubr.msk.f32.mxu0 %vm334_vm0, %v593_v4  ;;  %v3088_v8 = vld [vmem:[%s3070_s13 + $0x32] sm:$0xff]  ;;  %s3309_s18 = scalar_lea.vmem [#allocation2], %s2346_s17  ;;  %s2214_s10 = scalar_lea.sflag [#allocation3], %s3301_s26 }
  0x1e   : > { %2634 = vmatmul.mubr.msk.f32.vlgmr.msra.gmra.mrb[0].mxu0 %vm334_vm0, %v3074_v5  ;;  %v3091_v9 = vld [vmem:[%s3070_s13 + $0x42] sm:$0xff]  ;;  %v3098_v10 = vld [vmem:[%s3070_s13 + $0x52] sm:$0xff]  ;;  %s2232_s21 = sshll.u32 %s3309_s18, 4  ;;  %s2954_s17 = smov [#allocation2]   ;;  %s3344_s21 = int_to_ptr.vmem [resolvable:$true] %s2232_s21 }
  0x1f   : > { %2646 = vmatpush3.msra.mxu0 %v2383_v1  ;;  %2636 = vmatprep.mubr.msk.f32.mxu0 %vm334_vm0, %v3077_v6  ;;  %v3101_v11 = vld [vmem:[%s3070_s13 + $0x62] sm:$0xff]  ;;  %v2392_v13 = vld [vmem:[%s3070_s13 + $0x11] sm:$0xff]  ;;  %s2857_s12 = scalar_lea.vmem %s3344_s21, 1024 }
  0x20   : > { %2659 = vmatprep.subr.mxu0 %v2400_v7  ;;  %v324_v12 = vld [vmem:[%s3070_s13 + $0x1] sm:$0xff]  ;;  %v3115_v15 = vld [vmem:[%s3070_s13 + $0x72] sm:$0xff]  ;;  %p2858_p11 = scmp.ne.s32.totalorder %s3344_s21, %s2857_s12 }
  0x21   : > { %2605 = vmatprep.mubr.msk.f32.mxu1 %vm334_vm0, %v324_v12  ;;  %v3109_v14 = vld [vmem:[%s3070_s13 + $0x21] sm:$0xff]  ;;  %v2375_v16 = vld [vmem:[%s3070_s13 + $0x10] sm:$0xff] }
  0x22   : > { %2637 = vmatmul.mubr.msk.f32.gmra.mrb[2].mxu0 %vm334_vm0, %v3088_v8  ;;  %2606 = vmatmul.mubr.msk.f32.vlgmr.msra.gmra.mrb[0].mxu1 %vm334_vm0, %v2392_v13  ;;  %v3121_v17 = vld [vmem:[%s3070_s13 + $0x31] sm:$0xff]  ;;  %v3126_v18 = vld [vmem:[%s3070_s13 + $0x41] sm:$0xff]  ;;  %p2859_p12 = pnand %p2858_p11, %p3043_p5 }
  0x23   : > { %2639 = vmatprep.mubr.msk.f32.mxu0 %vm334_vm0, %v3091_v9  ;;  %2608 = vmatprep.mubr.msk.f32.mxu1 %vm334_vm0, %v3109_v14  ;;  %v2376_v19 = vld [vmem:[%s3070_s13 + $0x20] sm:$0xff]  ;;  %v2377_v20 = vld [vmem:[%s3070_s13 + $0x30] sm:$0xff] }
  0x24   : > { %2618 = vmatpush3.msra.mxu1 %v323_v3  ;;  %v3139_v22 = vld [vmem:[%s3070_s13 + $0x51] sm:$0xff]  ;;  %v2378_v23 = vld [vmem:[%s3070_s13 + $0x40] sm:$0xff]  ;;  %p2860_p13 = pneg %p2859_p12 }
  0x25   : > { %v3147_v24 = vld [vmem:[%s3070_s13 + $0x61] sm:$0xff]  ;;  %v2379_v25 = vld [vmem:[%s3070_s13 + $0x50] sm:$0xff]  ;;  %2729 = vmatprep.subr.mxu1 %v1663_v39 }
  0x26   : > { %2640 = vmatmul.mubr.msk.f32.gmra.mrb[4].mxu0 %vm334_vm0, %v3098_v10  ;;  %2609 = vmatmul.mubr.msk.f32.gmra.mrb[2].mxu1 %vm334_vm0, %v3121_v17  ;;  %v315_v26 = vld [vmem:[%s3070_s13] sm:$0xff]  ;;  %v2398_v27 = vld [vmem:[%s3070_s13 + $0x71] sm:$0xff] }
  0x27   : > { %2642 = vmatprep.mubr.msk.f32.mxu0 %vm334_vm0, %v3101_v11  ;;  %2611 = vmatprep.mubr.msk.f32.mxu1 %vm334_vm0, %v3126_v18  ;;  %v2380_v28 = vld [vmem:[%s3070_s13 + $0x60] sm:$0xff]  ;;  %v2381_v29 = vld [vmem:[%s3070_s13 + $0x70] sm:$0xff] }
  0x28   : > { %v2382_v30 = vld [vmem:[%s3070_s13 + $0x80] sm:$0xff]  ;;  %v2433_v36 = vld [vmem:[%s3070_s13 + $0x90] sm:$0xff] }
  0x29   : > { %v2399_v32 = vld [vmem:[%s3070_s13 + $0x81] sm:$0xff]  ;;  %v2450_v37 = vld [vmem:[%s3070_s13 + $0x91] sm:$0xff] }
  0x2a   : > { %2643 = vmatmul.mubr.msk.f32.gmra.mrb[6].mxu0 %vm334_vm0, %v3115_v15  ;;  %2612 = vmatmul.mubr.msk.f32.gmra.mrb[4].mxu1 %vm334_vm0, %v3139_v22  ;;  %v2416_v34 = vld [vmem:[%s3070_s13 + $0x82] sm:$0xff]  ;;  %v2467_v38 = vld [vmem:[%s3070_s13 + $0x92] sm:$0xff]  ;;  %s2861_s13 = sshll.u32 %s2954_s17, 4  ;;  %s2862_s13 = int_to_ptr.vmem [resolvable:$false] %s2861_s13 }
  0x2b   : > { %2647 = vmatprep.mubr.msk.f32.mxu0 %vm334_vm0, %v2375_v16  ;;  %2614 = vmatprep.mubr.msk.f32.mxu1 %vm334_vm0, %v3147_v24  ;;  %s2863_s19 = scalar_lea.vmem %s2862_s13, 2048  ;;  %p2864_p0 = scmp.lt.s32.totalorder %s3344_s21, %s2862_s13 }
  0x2c   : > { %p2865_p1 = scmp.lt.s32.totalorder %s2863_s19, %s2857_s12 }
  0x2e   : > { %2648 = vmatmul.mubr.msk.f32.vlgmr.msra.gmra.mrb[0].mxu0 %vm334_vm0, %v2376_v19  ;;  %2615 = vmatmul.mubr.msk.f32.gmra.mrb[6].mxu1 %vm334_vm0, %v2398_v27  ;;  %p2866_p2 = por %p2865_p1, %p2864_p0 }
  0x2f   : > { %2660 = vmatpush3.msra.mxu0 %v2400_v7  ;;  %2650 = vmatprep.mubr.msk.f32.mxu0 %vm334_vm0, %v2377_v20  ;;  %v1827_v7 = vld [vmem:[%s3507_s5 + $0x18] sm:$0xff] }
  0x30   : > { %2673 = vmatprep.subr.mxu0 %v2417_v21  ;;  %2619 = vmatprep.mubr.msk.f32.mxu1 %vm334_vm0, %v315_v26  ;;  %p2867_p3 = pnand %p2866_p2, %p2860_p13 }
  0x32   : > { %2651 = vmatmul.mubr.msk.f32.gmra.mrb[2].mxu0 %vm334_vm0, %v2378_v23  ;;  %2620 = vmatmul.mubr.msk.f32.vlgmr.msra.gmra.mrb[0].mxu1 %vm334_vm0, %v2375_v16 }
  0x33   : > { %2653 = vmatprep.mubr.msk.f32.mxu0 %vm334_vm0, %v2379_v25  ;;  %2622 = vmatprep.mubr.msk.f32.mxu1 %vm334_vm0, %v2376_v19 }
  0x34   : > { %2730 = vmatpush3.msra.mxu1 %v1663_v39 }
  0x35   : > { %1850 = vmatprep.subr.mxu1 %v1825_v40 }
  0x36   : > { %2654 = vmatmul.mubr.msk.f32.gmra.mrb[4].mxu0 %vm334_vm0, %v2380_v28  ;;  %2623 = vmatmul.mubr.msk.f32.gmra.mrb[2].mxu1 %vm334_vm0, %v2377_v20 }
  0x37   : > { %2656 = vmatprep.mubr.msk.f32.mxu0 %vm334_vm0, %v2381_v29  ;;  %2625 = vmatprep.mubr.msk.f32.mxu1 %vm334_vm0, %v2378_v23 }
  0x3a   : > { %2657 = vmatmul.mubr.msk.f32.gmra.mrb[6].mxu0 %vm334_vm0, %v2382_v30  ;;  %2626 = vmatmul.mubr.msk.f32.gmra.mrb[4].mxu1 %vm334_vm0, %v2379_v25 }
  0x3b   : > { %2661 = vmatprep.mubr.msk.f32.mxu0 %vm334_vm0, %v2392_v13  ;;  %2628 = vmatprep.mubr.msk.f32.mxu1 %vm334_vm0, %v2380_v28 }
  0x3e   : > { %2662 = vmatmul.mubr.msk.f32.vlgmr.msra.gmra.mrb[0].mxu0 %vm334_vm0, %v3109_v14  ;;  %2629 = vmatmul.mubr.msk.f32.gmra.mrb[6].mxu1 %vm334_vm0, %v2381_v29 }
  0x3f   : > { %2674 = vmatpush3.msra.mxu0 %v2417_v21  ;;  %2664 = vmatprep.mubr.msk.f32.mxu0 %vm334_vm0, %v3121_v17 }
  0x40   : > { %2687 = vmatprep.subr.mxu0 %v2434_v31 }
  0x42   : > { %2665 = vmatmul.mubr.msk.f32.gmra.mrb[2].mxu0 %vm334_vm0, %v3126_v18 }
  0x43   : > { %2667 = vmatprep.mubr.msk.f32.mxu0 %vm334_vm0, %v3139_v22 }
  0x46   : > { %2668 = vmatmul.mubr.msk.f32.gmra.mrb[4].mxu0 %vm334_vm0, %v3147_v24 }
  0x47   : > { %2670 = vmatprep.mubr.msk.f32.mxu0 %vm334_vm0, %v2398_v27 }
  0x4a   : > { %2671 = vmatmul.mubr.msk.f32.gmra.mrb[6].mxu0 %vm334_vm0, %v2399_v32 }
  0x4b   : > { %2675 = vmatprep.mubr.msk.f32.mxu0 %vm334_vm0, %v3074_v5 }
  0x4e   : > { %2676 = vmatmul.mubr.msk.f32.vlgmr.msra.gmra.mrb[0].mxu0 %vm334_vm0, %v3077_v6 }
  0x4f   : > { %2688 = vmatpush3.msra.mxu0 %v2434_v31  ;;  %2678 = vmatprep.mubr.msk.f32.mxu0 %vm334_vm0, %v3088_v8 }
  0x50   : > { %2701 = vmatprep.subr.mxu0 %v2451_v33 }
  0x52   : > { %2679 = vmatmul.mubr.msk.f32.gmra.mrb[2].mxu0 %vm334_vm0, %v3091_v9 }
  0x53   : > { %2681 = vmatprep.mubr.msk.f32.mxu0 %vm334_vm0, %v3098_v10 }
  0x56   : > { %2682 = vmatmul.mubr.msk.f32.gmra.mrb[4].mxu0 %vm334_vm0, %v3101_v11 }
  0x57   : > { %2684 = vmatprep.mubr.msk.f32.mxu0 %vm334_vm0, %v3115_v15 }
  0x5a   : > { %2685 = vmatmul.mubr.msk.f32.gmra.mrb[6].mxu0 %vm334_vm0, %v2416_v34 }
  0x5b   : > { %2689 = vmatprep.mubr.msk.f32.mxu0 %vm334_vm0, %v2376_v19 }
  0x5e   : > { %2690 = vmatmul.mubr.msk.f32.vlgmr.msra.gmra.mrb[0].mxu0 %vm334_vm0, %v2377_v20 }
  0x5f   : > { %2702 = vmatpush3.msra.mxu0 %v2451_v33  ;;  %2692 = vmatprep.mubr.msk.f32.mxu0 %vm334_vm0, %v2378_v23 }
  0x60   : > { %2715 = vmatprep.subr.mxu0 %v2468_v35 }
  0x62   : > { %2693 = vmatmul.mubr.msk.f32.gmra.mrb[2].mxu0 %vm334_vm0, %v2379_v25 }
  0x63   : > { %2695 = vmatprep.mubr.msk.f32.mxu0 %vm334_vm0, %v2380_v28  ;;  %v2953_v28 = vmov 0.0  }
  0x66   : > { %2696 = vmatmul.mubr.msk.f32.gmra.mrb[4].mxu0 %vm334_vm0, %v2381_v29  ;;  %v1826_v29 = vld [vmem:[%s3507_s5 + $0x10] sm:$0xff] }
  0x67   : > { %2698 = vmatprep.mubr.msk.f32.mxu0 %vm334_vm0, %v2382_v30  ;;  %v2478_v30 = vld [vmem:[%s3506_s4] ss:$0 sm:$0xff] }
  0x6a   : > { %2699 = vmatmul.mubr.msk.f32.gmra.mrb[6].mxu0 %vm334_vm0, %v2433_v36 }
  0x6b   : > { %2703 = vmatprep.mubr.msk.f32.mxu0 %vm334_vm0, %v3109_v14 }
  0x6e   : > { %2704 = vmatmul.mubr.msk.f32.vlgmr.msra.gmra.mrb[0].mxu0 %vm334_vm0, %v3121_v17 }
  0x6f   : > { %2716 = vmatpush3.msra.mxu0 %v2468_v35  ;;  %2706 = vmatprep.mubr.msk.f32.mxu0 %vm334_vm0, %v3126_v18 }
  0x72   : > { %2707 = vmatmul.mubr.msk.f32.gmra.mrb[2].mxu0 %vm334_vm0, %v3139_v22 }
  0x73   : > { %2709 = vmatprep.mubr.msk.f32.mxu0 %vm334_vm0, %v3147_v24 }
  0x76   : > { %2710 = vmatmul.mubr.msk.f32.gmra.mrb[4].mxu0 %vm334_vm0, %v2398_v27 }
  0x77   : > { %2712 = vmatprep.mubr.msk.f32.mxu0 %vm334_vm0, %v2399_v32 }
  0x7a   : > { %2713 = vmatmul.mubr.msk.f32.gmra.mrb[6].mxu0 %vm334_vm0, %v2450_v37 }
  0x7b   : > { %2717 = vmatprep.mubr.msk.f32.mxu0 %vm334_vm0, %v3077_v6 }
  0x7e   : > { %2718 = vmatmul.mubr.msk.f32.vlgmr.msra.gmra.mrb[0].mxu0 %vm334_vm0, %v3088_v8 }
  0x7f   : > { %2720 = vmatprep.mubr.msk.f32.mxu0 %vm334_vm0, %v3091_v9 }
  0x82   : > { %2721 = vmatmul.mubr.msk.f32.gmra.mrb[2].mxu0 %vm334_vm0, %v3098_v10 }
  0x83   : > { %2723 = vmatprep.mubr.msk.f32.mxu0 %vm334_vm0, %v3101_v11 }
  0x86   : > { %2724 = vmatmul.mubr.msk.f32.gmra.mrb[4].mxu0 %vm334_vm0, %v3115_v15 }
  0x87   : > { %2726 = vmatprep.mubr.msk.f32.mxu0 %vm334_vm0, %v2416_v34  ;;  %v1830_v34 = vlaneseq }
  0x8a   : > { %2727 = vmatmul.mubr.msk.f32.gmra.mrb[6].mxu0 %vm334_vm0, %v2467_v38 }
 0x105   : > { %v2621_v41 = vpop.f32.mrb[0].mxu1 }
 0x106   : > { %v554_v42 = vpop.f32.mrb[1].mxu1 }
 0x109   : > { %v2624_v43 = vpop.f32.mrb[2].mxu1 }
 0x10a   : > { %v564_v44 = vpop.f32.mrb[3].mxu1 }
 0x10d   : > { %v2627_v45 = vpop.f32.mrb[4].mxu1 }
 0x10e   : > { %v574_v46 = vpop.f32.mrb[5].mxu1 }
 0x111   : > { %v2630_v47 = vpop.f32.mrb[6].mxu1 }
 0x112   : > { %v584_v48 = vpop.f32.mrb[7].mxu1 }
 0x151   : > { %v2719_v49 = vpop.f32.mrb[0].mxu0 }
 0x152   : > { %v2743_v51 = vadd.f32 %v2719_v49, %v2621_v41  ;;  %v1577_v52 = vpop.f32.mrb[1].mxu0 }
 0x153   : > { %v2744_v53 = vadd.f32 %v1577_v52, %v554_v42  ;;  %v3307_v42 = vshrl.u32 %v1830_v34, 7 }
 0x154   : > { %v1632_v54 = vadd.f32 %v2743_v51, %v2477_v50 }
 0x155   : > { %v1631_v55 = vadd.f32 %v2744_v53, %v2477_v50  ;;  %v2722_v56 = vpop.f32.mrb[2].mxu0  ;;  %v1832_v51 = vsub.s32 0, %v3307_v42 }
 0x156   : > { %v1648_v57 = vmul.f32 0.2, %v1632_v54  ;;  %v2745_v58 = vadd.f32 %v2722_v56, %v2624_v43  ;;  %v1587_v59 = vpop.f32.mrb[3].mxu0  ;;  %vm1640_vm1 = vcmp.ge.f32.partialorder %v1632_v54, 0.0 }
 0x157   : > { %v1647_v60 = vmul.f32 0.2, %v1631_v55  ;;  %v2746_v61 = vadd.f32 %v1587_v59, %v564_v44  ;;  %vm1639_vm2 = vcmp.ge.f32.partialorder %v1631_v55, 0.0 }
 0x158   : > { %v1634_v62 = vadd.f32 %v2745_v58, %v2477_v50  ;;  %v3262_v3 = vsel %vm1640_vm1, %v1632_v54, %v1648_v57  ;;  %v3321_v54 = vld [vmem:[%s3508_s6] sm:$0xf] }
 0x159   : > { %v1633_v63 = vadd.f32 %v2746_v61, %v2477_v50  ;;  %v2725_v0 = vpop.f32.mrb[4].mxu0  ;;  %v3257_v1 = vsel %vm1639_vm2, %v1631_v55, %v1647_v60  ;;  %v1836_v55 = vsub.s32 1, %v3307_v42 }
 0x15a   : > { %v1650_v4 = vmul.f32 0.2, %v1634_v62  ;;  %v2747_v5 = vadd.f32 %v2725_v0, %v2627_v45  ;;  %v1597_v6 = vpop.f32.mrb[5].mxu0  ;;  %2731 = vmatprep.mubr.msk.f32.mxu1 %vm334_vm0, %v3257_v1  ;;  %vm1642_vm4 = vcmp.ge.f32.partialorder %v1634_v62, 0.0 }
 0x15b   : > { %v1649_v8 = vmul.f32 0.2, %v1633_v63  ;;  %v2748_v9 = vadd.f32 %v1597_v6, %v574_v46  ;;  %2732 = vmatmul.mubr.msk.f32.vlgmr.msra.gmra.mrb[8].mxu1 %vm334_vm0, %v3262_v3  ;;  %vm1641_vm3 = vcmp.ge.f32.partialorder %v1633_v63, 0.0 }
 0x15c   : > { %v1636_v10 = vadd.f32 %v2747_v5, %v2477_v50  ;;  %1851 = vmatpush1.msra.mxu1 %v1824_v2  ;;  %v1658_v17 = vsel %vm1642_vm4, %v1634_v62, %v1650_v4  ;;  %v3327_v62 = vrot.slane %v3321_v54, %v1832_v51 }
 0x15d   : > { %v1635_v11 = vadd.f32 %v2748_v9, %v2477_v50  ;;  %v2728_v12 = vpop.f32.mrb[6].mxu0  ;;  %v1657_v13 = vsel %vm1641_vm3, %v1633_v63, %v1649_v8  ;;  %1963 = vmatprep.subr.mxu1 %v1827_v7 }
 0x15e   : > { %v1652_v14 = vmul.f32 0.2, %v1636_v10  ;;  %v2749_v15 = vadd.f32 %v2728_v12, %v2630_v47  ;;  %v1607_v16 = vpop.f32.mrb[7].mxu0  ;;  %2734 = vmatprep.mubr.msk.f32.mxu1 %vm334_vm0, %v1657_v13  ;;  %vm1644_vm6 = vcmp.ge.f32.partialorder %v1636_v10, 0.0 }
 0x15f   : > { %v1651_v18 = vmul.f32 0.2, %v1635_v11  ;;  %v2750_v19 = vadd.f32 %v1607_v16, %v584_v48  ;;  %2735 = vmatmul.mubr.msk.f32.gmra.mrb[10].mxu1 %vm334_vm0, %v1658_v17  ;;  %vm1643_vm5 = vcmp.ge.f32.partialorder %v1635_v11, 0.0 }
 0x160   : > { %v1638_v20 = vadd.f32 %v2749_v15, %v2477_v50  ;;  %v1660_v24 = vsel %vm1644_vm6, %v1636_v10, %v1652_v14 }
 0x161   : > { %v1637_v21 = vadd.f32 %v2750_v19, %v2477_v50  ;;  %v1659_v22 = vsel %vm1643_vm5, %v1635_v11, %v1651_v18 }
 0x162   : > { %v1654_v23 = vmul.f32 0.2, %v1638_v20  ;;  %2737 = vmatprep.mubr.msk.f32.mxu1 %vm334_vm0, %v1659_v22  ;;  %vm1646_vm8 = vcmp.ge.f32.partialorder %v1638_v20, 0.0 }
 0x163   : > { %v1653_v25 = vmul.f32 0.2, %v1637_v21  ;;  %2738 = vmatmul.mubr.msk.f32.gmra.mrb[12].mxu1 %vm334_vm0, %v1660_v24  ;;  %vm1645_vm7 = vcmp.ge.f32.partialorder %v1637_v21, 0.0 }
 0x164   : > { %v1662_v27 = vsel %vm1646_vm8, %v1638_v20, %v1654_v23 }
 0x165   : > { %v1661_v26 = vsel %vm1645_vm7, %v1637_v21, %v1653_v25 }
 0x166   : > { %2740 = vmatprep.mubr.msk.f32.mxu1 %vm334_vm0, %v1661_v26 }
 0x167   : > { %2741 = vmatmul.mubr.msk.f32.gmra.mrb[14].mxu1 %vm334_vm0, %v1662_v27 }
 0x168   : > { %1914 = vmatprep.mubr.f32.mxu1 %v2953_v28 }
 0x16b   : > { %2487 = vmatmul.mubr.msk.f32.vlgmr.msra.gmra.mrb[16].mxu1 %vm334_vm0, %v3257_v1 }
 0x16c   : > { %1964 = vmatpush1.msra.mxu1 %v1826_v29  ;;  %1920 = vmatprep.mubr.f32.mxu1 %v2953_v28 }
 0x16f   : > { %2488 = vmatmul.mubr.msk.f32.gmra.mrb[18].mxu1 %vm334_vm0, %v3262_v3 }
 0x170   : > { %1926 = vmatprep.mubr.f32.mxu1 %v2953_v28 }
 0x173   : > { %2489 = vmatmul.mubr.msk.f32.gmra.mrb[20].mxu1 %vm334_vm0, %v1657_v13 }
 0x174   : > { %1932 = vmatprep.mubr.f32.mxu1 %v2953_v28 }
 0x177   : > { %2490 = vmatmul.mubr.msk.f32.gmra.mrb[22].mxu1 %vm334_vm0, %v1658_v17 }
 0x178   : > { %1938 = vmatprep.mubr.f32.mxu1 %v2953_v28 }
 0x17b   : > { %2491 = vmatmul.mubr.msk.f32.gmra.mrb[24].mxu1 %vm334_vm0, %v1659_v22 }
 0x17c   : > { %1944 = vmatprep.mubr.f32.mxu1 %v2953_v28 }
 0x17f   : > { %2492 = vmatmul.mubr.msk.f32.gmra.mrb[26].mxu1 %vm334_vm0, %v1660_v24 }
 0x180   : > { %1950 = vmatprep.mubr.f32.mxu1 %v2953_v28 }
 0x183   : > { %2493 = vmatmul.mubr.msk.f32.gmra.mrb[28].mxu1 %vm334_vm0, %v1661_v26 }
 0x184   : > { %1956 = vmatprep.mubr.f32.mxu1 %v2953_v28 }
 0x187   : > { %2494 = vmatmul.mubr.msk.f32.gmra.mrb[30].mxu1 %vm334_vm0, %v1662_v27 }
 0x188   : > { %2027 = vmatprep.mubr.f32.mxu1 %v2953_v28 }
 0x18b   : > { %2495 = vmatmul.mubr.msk.f32.vlgmr.msra.gmra.mrb[32].mxu1 %vm334_vm0, %v3257_v1  ;;  %v3334_v1 = vrot.slane %v3321_v54, %v1836_v55 }
 0x18c   : > { %2033 = vmatprep.mubr.f32.mxu1 %v2953_v28 }
 0x18f   : > { %2496 = vmatmul.mubr.msk.f32.gmra.mrb[34].mxu1 %vm334_vm0, %v3262_v3 }
 0x190   : > { %2039 = vmatprep.mubr.f32.mxu1 %v2953_v28 }
 0x193   : > { %2497 = vmatmul.mubr.msk.f32.gmra.mrb[36].mxu1 %vm334_vm0, %v1657_v13 }
 0x194   : > { %2045 = vmatprep.mubr.f32.mxu1 %v2953_v28 }
 0x197   : > { %2498 = vmatmul.mubr.msk.f32.gmra.mrb[38].mxu1 %vm334_vm0, %v1658_v17 }
 0x198   : > { %2051 = vmatprep.mubr.f32.mxu1 %v2953_v28 }
 0x19b   : > { %2499 = vmatmul.mubr.msk.f32.gmra.mrb[40].mxu1 %vm334_vm0, %v1659_v22 }
 0x19c   : > { %2057 = vmatprep.mubr.f32.mxu1 %v2953_v28 }
 0x19f   : > { %2500 = vmatmul.mubr.msk.f32.gmra.mrb[42].mxu1 %vm334_vm0, %v1660_v24 }
 0x1a0   : > { %2063 = vmatprep.mubr.f32.mxu1 %v2953_v28 }
 0x1a3   : > { %2501 = vmatmul.mubr.msk.f32.gmra.mrb[44].mxu1 %vm334_vm0, %v1661_v26 }
 0x1a4   : > { %2069 = vmatprep.mubr.f32.mxu1 %v2953_v28 }
 0x1a7   : > { %2502 = vmatmul.mubr.msk.f32.gmra.mrb[46].mxu1 %vm334_vm0, %v1662_v27 }
 0x22e   : > { %v2733_v31 = vpop.f32.mrb[8].mxu1 }
 0x22f   : > { %v1767_v32 = vadd.f32 %v2733_v31, %v2478_v30  ;;  %v1761_v33 = vpop.f32.mrb[9].mxu1 }
 0x230   : > { %v1762_v35 = vadd.f32 %v2478_v30, %v1761_v33 }
 0x231   : > { %vm1801_vm9 = vcmp.ge.f32.partialorder %v1767_v32, 0.0  ;;  %v1809_v36 = vmul.f32 0.2, %v1767_v32 }
 0x232   : > { %vm1800_vm11 = vcmp.ge.f32.partialorder %v1762_v35, 0.0  ;;  %v1808_v37 = vmul.f32 0.2, %v1762_v35  ;;  %v2736_v38 = vpop.f32.mrb[10].mxu1 }
 0x233   : > { %v1817_v39 = vsel %vm1801_vm9, %v1767_v32, %v1809_v36  ;;  %v1777_v40 = vadd.f32 %v2736_v38, %v2478_v30  ;;  %v1771_v41 = vpop.f32.mrb[11].mxu1 }
 0x234   : > { %2174 = vst.msk [vmem:[%s3309_s18 + $0x8] sm:$0xff] %vm2172_vm10, %v1817_v39  ;;  %v1816_v43 = vsel %vm1800_vm11, %v1762_v35, %v1808_v37  ;;  %v1772_v44 = vadd.f32 %v2478_v30, %v1771_v41 }
 0x235   : > { %2173 = vst.msk [vmem:[%s3309_s18] sm:$0xff] %vm2172_vm10, %v1816_v43  ;;  %vm1803_vm12 = vcmp.ge.f32.partialorder %v1777_v40, 0.0  ;;  %v1811_v45 = vmul.f32 0.2, %v1777_v40 }
 0x236   : > { %vm1802_vm13 = vcmp.ge.f32.partialorder %v1772_v44, 0.0  ;;  %v1810_v46 = vmul.f32 0.2, %v1772_v44  ;;  %v2739_v47 = vpop.f32.mrb[12].mxu1 }
 0x237   : > { %v1819_v48 = vsel %vm1803_vm12, %v1777_v40, %v1811_v45  ;;  %v1787_v49 = vadd.f32 %v2739_v47, %v2478_v30  ;;  %v1781_v50 = vpop.f32.mrb[13].mxu1 }
 0x238   : > { %2176 = vst.msk [vmem:[%s3309_s18 + $0x18] sm:$0xff] %vm2172_vm10, %v1819_v48  ;;  %v1818_v52 = vsel %vm1802_vm13, %v1772_v44, %v1810_v46  ;;  %v1782_v53 = vadd.f32 %v2478_v30, %v1781_v50 }
 0x239   : > { %2175 = vst.msk [vmem:[%s3309_s18 + $0x10] sm:$0xff] %vm2172_vm10, %v1818_v52  ;;  %vm1805_vm14 = vcmp.ge.f32.partialorder %v1787_v49, 0.0  ;;  %v1813_v56 = vmul.f32 0.2, %v1787_v49 }
 0x23a   : > { %vm1804_vm15 = vcmp.ge.f32.partialorder %v1782_v53, 0.0  ;;  %v1812_v57 = vmul.f32 0.2, %v1782_v53  ;;  %v2742_v58 = vpop.f32.mrb[14].mxu1 }
 0x23b   : > { %v1821_v59 = vsel %vm1805_vm14, %v1787_v49, %v1813_v56  ;;  %v1797_v60 = vadd.f32 %v2742_v58, %v2478_v30  ;;  %v1791_v61 = vpop.f32.mrb[15].mxu1 }
 0x23c   : > { %2178 = vst.msk [vmem:[%s3309_s18 + $0x28] sm:$0xff] %vm2172_vm10, %v1821_v59  ;;  %v1820_v63 = vsel %vm1804_vm15, %v1782_v53, %v1812_v57  ;;  %v1792_v0 = vadd.f32 %v2478_v30, %v1791_v61 }
 0x23d   : > { %2177 = vst.msk [vmem:[%s3309_s18 + $0x20] sm:$0xff] %vm2172_vm10, %v1820_v63  ;;  %vm1807_vm0 = vcmp.ge.f32.partialorder %v1797_v60, 0.0  ;;  %v1815_v2 = vmul.f32 0.2, %v1797_v60 }
 0x23e   : > { %vm1806_vm1 = vcmp.ge.f32.partialorder %v1792_v0, 0.0  ;;  %v1814_v3 = vmul.f32 0.2, %v1792_v0  ;;  %v1916_v4 = vpop.f32.mrb[16].mxu1 }
 0x23f   : > { %v1823_v5 = vsel %vm1807_vm0, %v1797_v60, %v1815_v2  ;;  %v1917_v6 = vadd.f32 %v1916_v4, %v3327_v62  ;;  %v1918_v7 = vpop.f32.mrb[17].mxu1 }
 0x240   : > { %2180 = vst.msk [vmem:[%s3309_s18 + $0x38] sm:$0xff] %vm2172_vm10, %v1823_v5  ;;  %v1822_v8 = vsel %vm1806_vm1, %v1792_v0, %v1814_v3  ;;  %v1919_v9 = vadd.f32 %v1918_v7, %v3334_v1 }
 0x241   : > { %2179 = vst.msk [vmem:[%s3309_s18 + $0x30] sm:$0xff] %vm2172_vm10, %v1822_v8  ;;  %vm2076_vm2 = vcmp.ge.f32.partialorder %v1917_v6, 0.0  ;;  %v2108_v10 = vmul.f32 0.2, %v1917_v6 }
 0x242   : > { %vm2077_vm3 = vcmp.ge.f32.partialorder %v1919_v9, 0.0  ;;  %v2109_v11 = vmul.f32 0.2, %v1919_v9  ;;  %v1922_v12 = vpop.f32.mrb[18].mxu1 }
 0x243   : > { %2870 = shalt.err (!%p2867_p3)
}
 0x244   : > { %s2871_s18 = scalar_lea.hbm %s3342_s25, 1024  ;;  %s2875_s24 = scalar_lea.hbm %s3509_s7, 2048 }
 0x245   : > { %p2872_p4 = scmp.ne.s32.totalorder %s3342_s25, %s2871_s18  ;;  %p2876_p9 = scmp.lt.u32.totalorder %s3342_s25, %s3509_s7 }
 0x246   : > { %p2877_p10 = scmp.lt.u32.totalorder %s2875_s24, %s2871_s18  ;;  %p2879_p12 = scmp.lt.u32.totalorder %s2871_s18, %s3342_s25 }
 0x247   : > { %p2873_p7 = pnand %p2872_p4, %p3043_p5 }
 0x248   : > { %p2878_p11 = por %p2877_p10, %p2876_p9 }
 0x249   : > { %p2874_p8 = pneg %p2873_p7 }
 0x24a   : > { %p2880_p13 = por %p2879_p12, %p2878_p11 }
 0x24c   : > { %p2881_p0 = pnand %p2880_p13, %p2874_p8 }
 0x24e   : > { %2884 = shalt.err (!%p2881_p0)
}
 0x24f   : > { %s2955_s12 = smov 128   ;;  %s2956_s19 = smov 8   ;;  %v2140_v13 = vsel %vm2076_vm2, %v1917_v6, %v2108_v10  ;;  %v1923_v14 = vadd.f32 %v1922_v12, %v3327_v62  ;;  %v1924_v15 = vpop.f32.mrb[19].mxu1  ;;  %v2141_v16 = vsel %vm2077_vm3, %v1919_v9, %v2109_v11  ;;  %v1840_v58 = vsub.s32 2, %v3307_v42 }
 0x250   : > { %2808 = dma.vmem_to_hbm [thread:$0]  (%p3043_p5), %s3344_s21, 1024, %s3342_s25, %s2214_s10, %s2955_s12, %s2955_s12, %s2956_s19   ;;  %v1925_v17 = vadd.f32 %v1924_v15, %v3334_v1  ;;  %v1928_v20 = vpop.f32.mrb[20].mxu1  ;;  %v1844_v61 = vsub.s32 3, %v3307_v42 }
 0x251   : > { %s3380_s18 = scalar_lea.vmem [#allocation4], %s2347_s22  ;;  %vm2080_vm4 = vcmp.ge.f32.partialorder %v1923_v14, 0.0  ;;  %v2112_v18 = vmul.f32 0.2, %v1923_v14  ;;  %v1929_v22 = vadd.f32 %v1928_v20, %v3327_v62  ;;  %v1930_v23 = vpop.f32.mrb[21].mxu1  ;;  %v3410_v6 = vrot.slane %v3321_v54, %v1840_v58  ;;  %s2512_s21 = sshll.u32 %s3026_s9, 12 }
 0x252   : > { %2181 = vst [vmem:[%s3380_s18] sm:$0xff] %v2140_v13  ;;  %2182 = vst [vmem:[%s3380_s18 + $0x8] sm:$0xff] %v2141_v16  ;;  %vm2081_vm5 = vcmp.ge.f32.partialorder %v1925_v17, 0.0  ;;  %v2113_v19 = vmul.f32 0.2, %v1925_v17  ;;  %v1931_v25 = vadd.f32 %v1930_v23, %v3334_v1  ;;  %v1934_v28 = vpop.f32.mrb[22].mxu1  ;;  %v3415_v42 = vrot.slane %v3321_v54, %v1844_v61  ;;  %s2248_s22 = sshll.u32 %s3380_s18, 4  ;;  %s3455_s20 = scalar_lea.hbm %s3510_s8, %s2512_s21  ;;  %s3457_s22 = int_to_ptr.vmem [resolvable:$true] %s2248_s22 }
 0x253   : > { %v2144_v21 = vsel %vm2080_vm4, %v1923_v14, %v2112_v18  ;;  %vm2084_vm6 = vcmp.ge.f32.partialorder %v1929_v22, 0.0  ;;  %v2116_v26 = vmul.f32 0.2, %v1929_v22  ;;  %v1935_v30 = vadd.f32 %v1934_v28, %v3327_v62  ;;  %v1936_v31 = vpop.f32.mrb[23].mxu1  ;;  %s2219_s9 = scalar_lea.sflag [#allocation5], %s3301_s26  ;;  %s2885_s23 = scalar_lea.vmem %s3457_s22, 4096 }
 0x254   : > { %2185 = vst [vmem:[%s3380_s18 + $0x20] sm:$0xff] %v2144_v21  ;;  %v2145_v24 = vsel %vm2081_vm5, %v1925_v17, %v2113_v19  ;;  %vm2085_vm7 = vcmp.ge.f32.partialorder %v1931_v25, 0.0  ;;  %v2117_v27 = vmul.f32 0.2, %v1931_v25  ;;  %v1937_v33 = vadd.f32 %v1936_v31, %v3334_v1  ;;  %v1940_v36 = vpop.f32.mrb[24].mxu1  ;;  %p2886_p1 = scmp.ne.s32.totalorder %s3457_s22, %s2885_s23  ;;  %s2957_s24 = smov [#allocation4]  }
 0x255   : > { %2186 = vst [vmem:[%s3380_s18 + $0x28] sm:$0xff] %v2145_v24  ;;  %v2148_v29 = vsel %vm2084_vm6, %v1929_v22, %v2116_v26  ;;  %vm2088_vm8 = vcmp.ge.f32.partialorder %v1935_v30, 0.0  ;;  %v2120_v34 = vmul.f32 0.2, %v1935_v30  ;;  %v1941_v38 = vadd.f32 %v1940_v36, %v3327_v62  ;;  %v1942_v39 = vpop.f32.mrb[25].mxu1  ;;  %s2889_s17 = sshll.u32 %s2957_s24, 4  ;;  %s2890_s17 = int_to_ptr.vmem [resolvable:$false] %s2889_s17 }
 0x256   : > { %2189 = vst [vmem:[%s3380_s18 + $0x40] sm:$0xff] %v2148_v29  ;;  %v2149_v32 = vsel %vm2085_vm7, %v1931_v25, %v2117_v27  ;;  %vm2089_vm9 = vcmp.ge.f32.partialorder %v1937_v33, 0.0  ;;  %v2121_v35 = vmul.f32 0.2, %v1937_v33  ;;  %v1943_v41 = vadd.f32 %v1942_v39, %v3334_v1  ;;  %v1946_v45 = vpop.f32.mrb[26].mxu1  ;;  %p2887_p2 = pnand %p2886_p1, %p3043_p5  ;;  %s2891_s13 = scalar_lea.vmem %s2890_s17, 8192 }
 0x257   : > { %2190 = vst [vmem:[%s3380_s18 + $0x48] sm:$0xff] %v2149_v32  ;;  %v2152_v37 = vsel %vm2088_vm8, %v1935_v30, %v2120_v34  ;;  %vm2092_vm10 = vcmp.ge.f32.partialorder %v1941_v38, 0.0  ;;  %v2124_v43 = vmul.f32 0.2, %v1941_v38  ;;  %v1947_v47 = vadd.f32 %v1946_v45, %v3327_v62  ;;  %v1948_v48 = vpop.f32.mrb[27].mxu1  ;;  %p2892_p4 = scmp.lt.s32.totalorder %s3457_s22, %s2890_s17  ;;  %p2893_p7 = scmp.lt.s32.totalorder %s2891_s13, %s2885_s23 }
 0x258   : > { %2193 = vst [vmem:[%s3380_s18 + $0x60] sm:$0xff] %v2152_v37  ;;  %v2153_v40 = vsel %vm2089_vm9, %v1937_v33, %v2121_v35  ;;  %vm2093_vm11 = vcmp.ge.f32.partialorder %v1943_v41, 0.0  ;;  %v2125_v44 = vmul.f32 0.2, %v1943_v41  ;;  %v1949_v50 = vadd.f32 %v1948_v48, %v3334_v1  ;;  %v1952_v53 = vpop.f32.mrb[28].mxu1  ;;  %p2888_p3 = pneg %p2887_p2 }
 0x259   : > { %2194 = vst [vmem:[%s3380_s18 + $0x68] sm:$0xff] %v2153_v40  ;;  %v2156_v46 = vsel %vm2092_vm10, %v1941_v38, %v2124_v43  ;;  %vm2096_vm12 = vcmp.ge.f32.partialorder %v1947_v47, 0.0  ;;  %v2128_v51 = vmul.f32 0.2, %v1947_v47  ;;  %v1953_v56 = vadd.f32 %v1952_v53, %v3327_v62  ;;  %v1954_v57 = vpop.f32.mrb[29].mxu1  ;;  %p2894_p8 = por %p2893_p7, %p2892_p4 }
 0x25a   : > { %2197 = vst [vmem:[%s3380_s18 + $0x80] sm:$0xff] %v2156_v46  ;;  %v2157_v49 = vsel %vm2093_vm11, %v1943_v41, %v2125_v44  ;;  %vm2097_vm13 = vcmp.ge.f32.partialorder %v1949_v50, 0.0  ;;  %v2129_v52 = vmul.f32 0.2, %v1949_v50  ;;  %v1955_v60 = vadd.f32 %v1954_v57, %v3334_v1  ;;  %v1958_v2 = vpop.f32.mrb[30].mxu1 }
 0x25b   : > { %2198 = vst [vmem:[%s3380_s18 + $0x88] sm:$0xff] %v2157_v49  ;;  %v2160_v55 = vsel %vm2096_vm12, %v1947_v47, %v2128_v51  ;;  %vm2100_vm14 = vcmp.ge.f32.partialorder %v1953_v56, 0.0  ;;  %v2132_v63 = vmul.f32 0.2, %v1953_v56  ;;  %v1959_v4 = vadd.f32 %v1958_v2, %v3327_v62  ;;  %v1960_v5 = vpop.f32.mrb[31].mxu1  ;;  %p2895_p9 = pnand %p2894_p8, %p2888_p3 }
 0x25c   : > { %2201 = vst [vmem:[%s3380_s18 + $0xa0] sm:$0xff] %v2160_v55  ;;  %v2161_v59 = vsel %vm2097_vm13, %v1949_v50, %v2129_v52  ;;  %vm2101_vm15 = vcmp.ge.f32.partialorder %v1955_v60, 0.0  ;;  %v2133_v0 = vmul.f32 0.2, %v1955_v60  ;;  %v1961_v8 = vadd.f32 %v1960_v5, %v3334_v1 }
 0x25d   : > { %2202 = vst [vmem:[%s3380_s18 + $0xa8] sm:$0xff] %v2161_v59  ;;  %v2164_v3 = vsel %vm2100_vm14, %v1953_v56, %v2132_v63  ;;  %vm2104_vm0 = vcmp.ge.f32.partialorder %v1959_v4, 0.0  ;;  %v2136_v9 = vmul.f32 0.2, %v1959_v4 }
 0x25e   : > { %2205 = vst [vmem:[%s3380_s18 + $0xc0] sm:$0xff] %v2164_v3  ;;  %v2165_v7 = vsel %vm2101_vm15, %v1955_v60, %v2133_v0  ;;  %vm2105_vm1 = vcmp.ge.f32.partialorder %v1961_v8, 0.0  ;;  %v2137_v10 = vmul.f32 0.2, %v1961_v8  ;;  %v2029_v11 = vpop.f32.mrb[32].mxu1 }
 0x25f   : > { %2206 = vst [vmem:[%s3380_s18 + $0xc8] sm:$0xff] %v2165_v7  ;;  %v2168_v62 = vsel %vm2104_vm0, %v1959_v4, %v2136_v9  ;;  %v2030_v12 = vadd.f32 %v2029_v11, %v3410_v6  ;;  %v2031_v13 = vpop.f32.mrb[33].mxu1 }
 0x260   : > { %2209 = vst [vmem:[%s3380_s18 + $0xe0] sm:$0xff] %v2168_v62  ;;  %v2169_v14 = vsel %vm2105_vm1, %v1961_v8, %v2137_v10  ;;  %v2032_v15 = vadd.f32 %v2031_v13, %v3415_v42 }
 0x261   : > { %2210 = vst [vmem:[%s3380_s18 + $0xe8] sm:$0xff] %v2169_v14  ;;  %vm2078_vm2 = vcmp.ge.f32.partialorder %v2030_v12, 0.0  ;;  %v2110_v54 = vmul.f32 0.2, %v2030_v12 }
 0x262   : > { %vm2079_vm3 = vcmp.ge.f32.partialorder %v2032_v15, 0.0  ;;  %v2111_v1 = vmul.f32 0.2, %v2032_v15  ;;  %v2035_v16 = vpop.f32.mrb[34].mxu1 }
 0x263   : > { %v2142_v17 = vsel %vm2078_vm2, %v2030_v12, %v2110_v54  ;;  %v2036_v18 = vadd.f32 %v2035_v16, %v3410_v6  ;;  %v2037_v19 = vpop.f32.mrb[35].mxu1 }
 0x264   : > { %2183 = vst [vmem:[%s3380_s18 + $0x10] sm:$0xff] %v2142_v17  ;;  %v2143_v20 = vsel %vm2079_vm3, %v2032_v15, %v2111_v1  ;;  %v2038_v21 = vadd.f32 %v2037_v19, %v3415_v42 }
 0x265   : > { %2184 = vst [vmem:[%s3380_s18 + $0x18] sm:$0xff] %v2143_v20  ;;  %vm2082_vm4 = vcmp.ge.f32.partialorder %v2036_v18, 0.0  ;;  %v2114_v22 = vmul.f32 0.2, %v2036_v18 }
 0x266   : > { %vm2083_vm5 = vcmp.ge.f32.partialorder %v2038_v21, 0.0  ;;  %v2115_v23 = vmul.f32 0.2, %v2038_v21  ;;  %v2041_v24 = vpop.f32.mrb[36].mxu1 }
 0x267   : > { %v2146_v25 = vsel %vm2082_vm4, %v2036_v18, %v2114_v22  ;;  %v2042_v26 = vadd.f32 %v2041_v24, %v3410_v6  ;;  %v2043_v27 = vpop.f32.mrb[37].mxu1 }
 0x268   : > { %2187 = vst [vmem:[%s3380_s18 + $0x30] sm:$0xff] %v2146_v25  ;;  %v2147_v28 = vsel %vm2083_vm5, %v2038_v21, %v2115_v23  ;;  %v2044_v29 = vadd.f32 %v2043_v27, %v3415_v42 }
 0x269   : > { %2188 = vst [vmem:[%s3380_s18 + $0x38] sm:$0xff] %v2147_v28  ;;  %vm2086_vm6 = vcmp.ge.f32.partialorder %v2042_v26, 0.0  ;;  %v2118_v30 = vmul.f32 0.2, %v2042_v26 }
 0x26a   : > { %vm2087_vm7 = vcmp.ge.f32.partialorder %v2044_v29, 0.0  ;;  %v2119_v31 = vmul.f32 0.2, %v2044_v29  ;;  %v2047_v32 = vpop.f32.mrb[38].mxu1 }
 0x26b   : > { %v2150_v33 = vsel %vm2086_vm6, %v2042_v26, %v2118_v30  ;;  %v2048_v34 = vadd.f32 %v2047_v32, %v3410_v6  ;;  %v2049_v35 = vpop.f32.mrb[39].mxu1 }
 0x26c   : > { %2191 = vst [vmem:[%s3380_s18 + $0x50] sm:$0xff] %v2150_v33  ;;  %v2151_v36 = vsel %vm2087_vm7, %v2044_v29, %v2119_v31  ;;  %v2050_v37 = vadd.f32 %v2049_v35, %v3415_v42 }
 0x26d   : > { %2192 = vst [vmem:[%s3380_s18 + $0x58] sm:$0xff] %v2151_v36  ;;  %vm2090_vm8 = vcmp.ge.f32.partialorder %v2048_v34, 0.0  ;;  %v2122_v38 = vmul.f32 0.2, %v2048_v34 }
 0x26e   : > { %vm2091_vm9 = vcmp.ge.f32.partialorder %v2050_v37, 0.0  ;;  %v2123_v39 = vmul.f32 0.2, %v2050_v37  ;;  %v2053_v40 = vpop.f32.mrb[40].mxu1 }
 0x26f   : > { %v2154_v41 = vsel %vm2090_vm8, %v2048_v34, %v2122_v38  ;;  %v2054_v43 = vadd.f32 %v2053_v40, %v3410_v6  ;;  %v2055_v44 = vpop.f32.mrb[41].mxu1 }
 0x270   : > { %2195 = vst [vmem:[%s3380_s18 + $0x70] sm:$0xff] %v2154_v41  ;;  %v2155_v45 = vsel %vm2091_vm9, %v2050_v37, %v2123_v39  ;;  %v2056_v46 = vadd.f32 %v2055_v44, %v3415_v42 }
 0x271   : > { %2196 = vst [vmem:[%s3380_s18 + $0x78] sm:$0xff] %v2155_v45  ;;  %vm2094_vm10 = vcmp.ge.f32.partialorder %v2054_v43, 0.0  ;;  %v2126_v47 = vmul.f32 0.2, %v2054_v43 }
 0x272   : > { %vm2095_vm11 = vcmp.ge.f32.partialorder %v2056_v46, 0.0  ;;  %v2127_v48 = vmul.f32 0.2, %v2056_v46  ;;  %v2059_v49 = vpop.f32.mrb[42].mxu1 }
 0x273   : > { %v2158_v50 = vsel %vm2094_vm10, %v2054_v43, %v2126_v47  ;;  %v2060_v51 = vadd.f32 %v2059_v49, %v3410_v6  ;;  %v2061_v52 = vpop.f32.mrb[43].mxu1 }
 0x274   : > { %2199 = vst [vmem:[%s3380_s18 + $0x90] sm:$0xff] %v2158_v50  ;;  %v2159_v53 = vsel %vm2095_vm11, %v2056_v46, %v2127_v48  ;;  %v2062_v55 = vadd.f32 %v2061_v52, %v3415_v42 }
 0x275   : > { %2200 = vst [vmem:[%s3380_s18 + $0x98] sm:$0xff] %v2159_v53  ;;  %vm2098_vm12 = vcmp.ge.f32.partialorder %v2060_v51, 0.0  ;;  %v2130_v56 = vmul.f32 0.2, %v2060_v51 }
 0x276   : > { %vm2099_vm13 = vcmp.ge.f32.partialorder %v2062_v55, 0.0  ;;  %v2131_v57 = vmul.f32 0.2, %v2062_v55  ;;  %v2065_v58 = vpop.f32.mrb[44].mxu1 }
 0x277   : > { %v2162_v59 = vsel %vm2098_vm12, %v2060_v51, %v2130_v56  ;;  %v2066_v60 = vadd.f32 %v2065_v58, %v3410_v6  ;;  %v2067_v61 = vpop.f32.mrb[45].mxu1 }
 0x278   : > { %2203 = vst [vmem:[%s3380_s18 + $0xb0] sm:$0xff] %v2162_v59  ;;  %v2163_v63 = vsel %vm2099_vm13, %v2062_v55, %v2131_v57  ;;  %v2068_v0 = vadd.f32 %v2067_v61, %v3415_v42 }
 0x279   : > { %2204 = vst [vmem:[%s3380_s18 + $0xb8] sm:$0xff] %v2163_v63  ;;  %vm2102_vm14 = vcmp.ge.f32.partialorder %v2066_v60, 0.0  ;;  %v2134_v2 = vmul.f32 0.2, %v2066_v60 }
 0x27a   : > { %vm2103_vm15 = vcmp.ge.f32.partialorder %v2068_v0, 0.0  ;;  %v2135_v3 = vmul.f32 0.2, %v2068_v0  ;;  %v2071_v4 = vpop.f32.mrb[46].mxu1 }
 0x27b   : > { %v2166_v5 = vsel %vm2102_vm14, %v2066_v60, %v2134_v2  ;;  %v2072_v7 = vadd.f32 %v2071_v4, %v3410_v6  ;;  %v2073_v8 = vpop.f32.mrb[47].mxu1 }
 0x27c   : > { %2207 = vst [vmem:[%s3380_s18 + $0xd0] sm:$0xff] %v2166_v5  ;;  %v2167_v9 = vsel %vm2103_vm15, %v2068_v0, %v2135_v3  ;;  %v2074_v10 = vadd.f32 %v2073_v8, %v3415_v42 }
 0x27d   : > { %2208 = vst [vmem:[%s3380_s18 + $0xd8] sm:$0xff] %v2167_v9  ;;  %vm2106_vm0 = vcmp.ge.f32.partialorder %v2072_v7, 0.0  ;;  %v2138_v11 = vmul.f32 0.2, %v2072_v7 }
 0x27e   : > { %vm2107_vm1 = vcmp.ge.f32.partialorder %v2074_v10, 0.0  ;;  %v2139_v62 = vmul.f32 0.2, %v2074_v10 }
 0x27f   : > { %v2170_v6 = vsel %vm2106_vm0, %v2072_v7, %v2138_v11 }
 0x280   : > { %2211 = vst [vmem:[%s3380_s18 + $0xf0] sm:$0xff] %v2170_v6  ;;  %v2171_v12 = vsel %vm2107_vm1, %v2074_v10, %v2139_v62 }
 0x281   : > { %2212 = vst [vmem:[%s3380_s18 + $0xf8] sm:$0xff] %v2171_v12 }
 0x282   : > { %2898 = shalt.err (!%p2895_p9)
}
 0x283   : > { %s2899_s12 = scalar_lea.hbm %s3455_s20, 4096  ;;  %s2903_s21 = scalar_lea.hbm %s3510_s8, 8192 }
 0x284   : > { %p2900_p10 = scmp.ne.s32.totalorder %s3455_s20, %s2899_s12  ;;  %p2904_p13 = scmp.lt.u32.totalorder %s3455_s20, %s3510_s8 }
 0x285   : > { %p2905_p0 = scmp.lt.u32.totalorder %s2903_s21, %s2899_s12  ;;  %p2907_p2 = scmp.lt.u32.totalorder %s2899_s12, %s3455_s20 }
 0x286   : > { %p2901_p11 = pnand %p2900_p10, %p3043_p5 }
 0x287   : > { %p2906_p1 = por %p2905_p0, %p2904_p13 }
 0x288   : > { %p2902_p12 = pneg %p2901_p11 }
 0x289   : > { %p2908_p3 = por %p2907_p2, %p2906_p1 }
 0x28b   : > { %p2909_p4 = pnand %p2908_p3, %p2902_p12 }
 0x28d   : > { %2912 = shalt.err (!%p2909_p4)
}
 0x28e   : > { %s2958_s23 = smov 512   ;;  %s2959_s24 = smov 32  }
 0x28f   : > { %2809 = dma.vmem_to_hbm [thread:$0]  (%p3043_p5), %s3457_s22, 4096, %s3455_s20, %s2219_s9, %s2958_s23, %s2958_s23, %s2959_s24  }
 0x290 PF: > { %p2819_p7 = scmp.ge.s32.totalorder %s2951_s30, 2  ;;  %s2263_s17 = sand.u32 1, %s2939_s27  }
 0x291   : > { %s2264_s13 = scalar_lea.sflag [#allocation3], %s2263_s17 }
 0x292   : > { %p2813_p8 = pnand %p2819_p7, %p3047_p6 }
 0x294   : > { %2930 = dma.done.wait (!%p2813_p8), %s2264_s13, 1024  }
 0x295   : > { %2932 = vsyncadd (!%p2813_p8), %s2264_s13, 4294966272  ;;  %s2273_s12 = scalar_lea.sflag [#allocation5], %s2263_s17 }
 0x296   : > { %2934 = dma.done.wait (!%p2813_p8), %s2273_s12, 4096  }
 0x297   : > { %2936 = vsyncadd (!%p2813_p8), %s2273_s12, 4294963200  ;;  %p22_p5 = scmp.ge.s32.totalorder %s3030_s11, 4   ;;  %s3513_s27 = smov %s2943_s28 }
 0x298   : > { %s3514_s28 = smov %s2947_s29  ;;  %s3515_s29 = smov %s3041_s14 }
 0x299   : > { %s3516_s30 = smov %s3030_s11  ;;  %24 = sbr.rel (!%p22_p5) target bundleno = 5 (0x5), region = 110 }
 0x2a0   :  { %2278 = vsyncpa [#allocation3], 1 }
 0x2a1   :  { %2280 = vsyncpa [#allocation3 + $0x1], 1 }
 0x2a2   :  { %2281 = vsyncpa [#allocation5], 1 }
 0x2a3   :  { %2283 = vsyncpa [#allocation5 + $0x1], 1 }

</bundles_post_ra>
